<compile_context>
chip_gen: v7x
topology: tpu7x:2x2x1
jax: 0.10.0
libtpu: 0.0.40
codegen_flags: <defaults>
</compile_context>

<pallas_src>
import jax
import jax.numpy as jnp
from jax import lax
from jax.experimental import pallas as pl
from jax.experimental.pallas import tpu as pltpu


# ----------------------------------------------------------------------------
# Pallas kernel: BiLSTM (masked/packed) + LayerNorm + masked mean-pool + Linear
# ----------------------------------------------------------------------------
def _bilstm_kernel(emb_ref, mask_ref,
                   wih_ref, whh_f_ref, whh_b_ref, bias_ref,
                   gamma_ref, beta_ref, wc_ref, bc_ref,
                   logits_ref, out_ref):
    T, B, E = emb_ref.shape
    H = whh_f_ref.shape[0]           # whh_* passed transposed: (H, 4H)
    H4 = 4 * H

    # ---- hoisted input projections: both directions, all timesteps ---------
    # One (T*B, E) x (E, 8H) MXU matmul instead of 2*T tiny ones in the loop.
    # TODO(synk): at larger E/H, cast operands to bf16 (keep f32 accumulation);
    # kept f32 here to match the PyTorch module's numerics exactly.
    x = emb_ref[...].reshape(T * B, E)
    gates_x = (jnp.dot(x, wih_ref[...], preferred_element_type=jnp.float32)
               + bias_ref[...]).reshape(T, B, 2 * H4)

    mask = mask_ref[...]             # (T, B, 1) float {0, 1}
    whh_f = whh_f_ref[...]
    whh_b = whh_b_ref[...]

    def gates_to_hc(g, c):
        i_g = jax.nn.sigmoid(g[:, 0:H])
        f_g = jax.nn.sigmoid(g[:, H:2 * H])
        g_g = jnp.tanh(g[:, 2 * H:3 * H])
        o_g = jax.nn.sigmoid(g[:, 3 * H:4 * H])
        c_new = f_g * c + i_g * g_g
        h_new = o_g * jnp.tanh(c_new)
        return h_new, c_new

    zeros = jnp.zeros((B, H), jnp.float32)
    h_f, c_f, h_b, c_b = zeros, zeros, zeros, zeros

    # ---- fused + fully unrolled fwd/bwd recurrence --------------------------
    for step in range(T):
        tf = step
        tb = T - 1 - step
        # Two independent recurrent matmuls: issue both before consuming either.
        g_f = gates_x[tf, :, 0:H4] + jnp.dot(
            h_f, whh_f, preferred_element_type=jnp.float32)
        g_b = gates_x[tb, :, H4:2 * H4] + jnp.dot(
            h_b, whh_b, preferred_element_type=jnp.float32)
        m_f = mask[tf]                                  # (B, 1)
        m_b = mask[tb]
        hf_new, cf_new = gates_to_hc(g_f, c_f)
        hb_new, cb_new = gates_to_hc(g_b, c_b)
        out_ref[tf, :, 0:H] = m_f * hf_new              # zero output at pads
        out_ref[tb, :, H:2 * H] = m_b * hb_new
        h_f = m_f * hf_new + (1.0 - m_f) * h_f          # pad step: state frozen
        c_f = m_f * cf_new + (1.0 - m_f) * c_f
        h_b = m_b * hb_new + (1.0 - m_b) * h_b
        c_b = m_b * cb_new + (1.0 - m_b) * c_b

    # ---- LayerNorm + mask + mean over time: one vectorized pass -------------
    hcat = out_ref[...]                                           # (T, B, 2H)
    mu = jnp.mean(hcat, axis=-1, keepdims=True)
    var = jnp.mean((hcat - mu) ** 2, axis=-1, keepdims=True)
    ln = (hcat - mu) * lax.rsqrt(var + 1e-5) * gamma_ref[...] + beta_ref[...]
    # torch: LN(padded-zeros too), then * mask, then mean over dim=1 (i.e. /T)
    pooled = jnp.sum(ln * mask, axis=0) * (1.0 / T)               # (B, 2H)

    # ---- classifier ----------------------------------------------------------
    logits_ref[...] = (jnp.dot(pooled, wc_ref[...],
                               preferred_element_type=jnp.float32)
                       + bc_ref[...])


def bilstm_pallas(emb_tbe, mask_tb1, params, *, b_tile=8):
    """emb_tbe: (T, B, E) f32; mask_tb1: (T, B, 1) f32 -> logits (B, C) f32."""
    T, B, E = emb_tbe.shape
    H = params["whh_f"].shape[0]       # whh stored transposed: (H, 4H)
    C = params["wc"].shape[1]          # classifier stored transposed: (2H, C)

    # Pad batch (sublane dim) to a multiple of b_tile (>= 8) so vregs and MXU
    # rows are dense; padded rows carry mask == 0 and are sliced off below.
    B_pad = ((B + b_tile - 1) // b_tile) * b_tile
    if B_pad != B:
        emb_tbe = jnp.pad(emb_tbe, ((0, 0), (0, B_pad - B), (0, 0)))
        mask_tb1 = jnp.pad(mask_tb1, ((0, 0), (0, B_pad - B), (0, 0)))

    # Concatenate both directions so the hoisted X @ W_ih is a single matmul.
    wih = jnp.concatenate([params["wih_f"], params["wih_b"]], axis=1)   # (E,8H)
    bias = jnp.concatenate([params["b_f"], params["b_b"]], axis=1)      # (1,8H)

    def _full(arr):
        nd = arr.ndim
        return pl.BlockSpec(arr.shape, lambda b, nd=nd: (0,) * nd)

    grid = (B_pad // b_tile,)
    logits = pl.pallas_call(
        _bilstm_kernel,
        out_shape=jax.ShapeDtypeStruct((B_pad, C), jnp.float32),
        grid=grid,
        in_specs=[
            pl.BlockSpec((T, b_tile, E), lambda b: (0, b, 0)),   # embeddings
            pl.BlockSpec((T, b_tile, 1), lambda b: (0, b, 0)),   # mask
            _full(wih), _full(params["whh_f"]), _full(params["whh_b"]),
            _full(bias), _full(params["gamma"]), _full(params["beta"]),
            _full(params["wc"]), _full(params["bc"]),
        ],
        out_specs=pl.BlockSpec((b_tile, C), lambda b: (b, 0)),
        scratch_shapes=[pltpu.VMEM((T, b_tile, 2 * H), jnp.float32)],
        compiler_params=pltpu.CompilerParams(
            dimension_semantics=("parallel",),
            vmem_limit_bytes=32 * 1024 * 1024,
        ),
    )(emb_tbe, mask_tb1, wih, params["whh_f"], params["whh_b"], bias,
      params["gamma"], params["beta"], params["wc"], params["bc"])

    return logits[:B]


# ----------------------------------------------------------------------------
# Plain-JAX glue: embedding lookup, focal loss, parameter init
# ----------------------------------------------------------------------------
def focal_loss(logits, target, gamma=2.0):
    # TODO(synk): FocalLoss class is not defined in the reference source;
    # standard focal loss (gamma=2, no alpha, mean reduction) is assumed.
    logp = jax.nn.log_softmax(logits, axis=-1)
    logpt = jnp.take_along_axis(logp, target[:, None], axis=-1)[:, 0]
    pt = jnp.exp(logpt)
    return jnp.mean(-((1.0 - pt) ** gamma) * logpt)


def init_params(key, vocab_size, embedding_size, hidden_size, num_classes):
    E, H, C = embedding_size, hidden_size, num_classes
    ks = jax.random.split(key, 12)
    s_lstm = 1.0 / jnp.sqrt(H)
    s_cls = 1.0 / jnp.sqrt(2 * H)
    u = lambda k, shp, s: jax.random.uniform(k, shp, jnp.float32, -s, s)

    # LSTM weights stored pre-transposed for x @ W; biases are b_ih + b_hh.
    params = {
        "embedding": jax.random.normal(ks[0], (vocab_size, E), jnp.float32),
        "wih_f": u(ks[1], (E, 4 * H), s_lstm),
        "whh_f": u(ks[2], (H, 4 * H), s_lstm),
        "b_f": (u(ks[3], (1, 4 * H), s_lstm) + u(ks[4], (1, 4 * H), s_lstm)),
        "wih_b": u(ks[5], (E, 4 * H), s_lstm),
        "whh_b": u(ks[6], (H, 4 * H), s_lstm),
        "b_b": (u(ks[7], (1, 4 * H), s_lstm) + u(ks[8], (1, 4 * H), s_lstm)),
        "gamma": jnp.ones((1, 2 * H), jnp.float32),
        "beta": jnp.zeros((1, 2 * H), jnp.float32),
        "wc": u(ks[9], (2 * H, C), s_cls),
        "bc": u(ks[10], (1, C), s_cls),
    }
    return params


@jax.jit
def text_bilstm_forward(params, input_ids, input_mask, target):
    # Gather embeddings directly in time-major order (only the tiny id matrix
    # is transposed).  emb_dropout / lstm_dropout are identity (eval mode).
    ids_tm = jnp.transpose(input_ids)                              # (T, B)
    emb_tbe = jnp.take(params["embedding"], ids_tm, axis=0)        # (T, B, E)
    mask_tb1 = jnp.transpose(input_mask).astype(jnp.float32)[..., None]
    logits = bilstm_pallas(emb_tbe, mask_tb1, params)              # (B, C)
    loss = focal_loss(logits, target)
    return loss, logits


# ----------------------------------------------------------------------------
if __name__ == "__main__":
    vocab_size, embedding_size, hidden_size, num_classes = 100, 32, 32, 8
    B, T = 2, 8

    key = jax.random.PRNGKey(0)
    k_param, k_ids, k_tgt = jax.random.split(key, 3)

    params = init_params(k_param, vocab_size, embedding_size,
                         hidden_size, num_classes)

    input_ids = jax.random.randint(k_ids, (B, T), 0, vocab_size, jnp.int32)
    lengths = jnp.array([8, 5], jnp.int32)
    input_mask = (jnp.arange(T)[None, :] < lengths[:, None]).astype(jnp.int32)
    target = jax.random.randint(k_tgt, (B,), 0, num_classes, jnp.int32)

    loss, logits = text_bilstm_forward(params, input_ids, input_mask, target)
    jax.block_until_ready((loss, logits))

    assert logits.shape == (B, num_classes)
    assert bool(jnp.isfinite(loss))
    assert bool(jnp.all(jnp.isfinite(logits)))
    print("KERNEL_OK")
</pallas_src>

<mosaic_0001>
module attributes {stable_mosaic.version = 11 : i64} {
  func.func @_bilstm_kernel(%arg0: i32, %arg1: memref<8x8x32xf32, #tpu.memory_space<vmem>>, %arg2: memref<8x8x1xf32, #tpu.memory_space<vmem>>, %arg3: memref<32x256xf32, #tpu.memory_space<vmem>>, %arg4: memref<32x128xf32, #tpu.memory_space<vmem>>, %arg5: memref<32x128xf32, #tpu.memory_space<vmem>>, %arg6: memref<1x256xf32, #tpu.memory_space<vmem>>, %arg7: memref<1x64xf32, #tpu.memory_space<vmem>>, %arg8: memref<1x64xf32, #tpu.memory_space<vmem>>, %arg9: memref<64x8xf32, #tpu.memory_space<vmem>>, %arg10: memref<1x8xf32, #tpu.memory_space<vmem>>, %arg11: memref<8x8xf32, #tpu.memory_space<vmem>>, %arg12: memref<8x8x64xf32, #tpu.memory_space<vmem>>) attributes {dimension_semantics = [#tpu.dimension_semantics<parallel>], iteration_bounds = array<i64: 1>, scalar_prefetch = 0 : i64, scratch_operands = 1 : i64, tpu.core_type = #tpu.core_type<tc>, window_params = [{transform_indices = @transform_0, window_bounds = array<i64: 8, 8, 32>}, {transform_indices = @transform_1, window_bounds = array<i64: 8, 8, 1>}, {pipeline_mode = #tpu.pipeline_mode<synchronous>, transform_indices = @transform_2, window_bounds = array<i64: 32, 256>}, {pipeline_mode = #tpu.pipeline_mode<synchronous>, transform_indices = @transform_3, window_bounds = array<i64: 32, 128>}, {pipeline_mode = #tpu.pipeline_mode<synchronous>, transform_indices = @transform_4, window_bounds = array<i64: 32, 128>}, {pipeline_mode = #tpu.pipeline_mode<synchronous>, transform_indices = @transform_5, window_bounds = array<i64: 1, 256>}, {pipeline_mode = #tpu.pipeline_mode<synchronous>, transform_indices = @transform_6, window_bounds = array<i64: 1, 64>}, {pipeline_mode = #tpu.pipeline_mode<synchronous>, transform_indices = @transform_7, window_bounds = array<i64: 1, 64>}, {pipeline_mode = #tpu.pipeline_mode<synchronous>, transform_indices = @transform_8, window_bounds = array<i64: 64, 8>}, {pipeline_mode = #tpu.pipeline_mode<synchronous>, transform_indices = @transform_9, window_bounds = array<i64: 1, 8>}, {transform_indices = @transform_10, window_bounds = array<i64: 8, 8>}]} {
    %c0 = arith.constant 0 : index
    %c0_0 = arith.constant 0 : index
    %c0_1 = arith.constant 0 : index
    %0 = vector.load %arg1[%c0, %c0_0, %c0_1] : memref<8x8x32xf32, #tpu.memory_space<vmem>>, vector<8x8x32xf32>
    %1 = vector.shape_cast %0 : vector<8x8x32xf32> to vector<64x32xf32>
    %c0_2 = arith.constant 0 : index
    %c0_3 = arith.constant 0 : index
    %2 = vector.load %arg3[%c0_2, %c0_3] : memref<32x256xf32, #tpu.memory_space<vmem>>, vector<32x256xf32>
    %cst = arith.constant dense<0.000000e+00> : vector<64x256xf32>
    %3 = tpu.matmul %1, %2, %cst {dimension_numbers = #tpu.dot_dimension_numbers<[1], [0], [0], [1], [0, 0, 1, 1], [], []>} : vector<64x32xf32>, vector<32x256xf32>, vector<64x256xf32> -> vector<64x256xf32>
    %c0_4 = arith.constant 0 : index
    %c0_5 = arith.constant 0 : index
    %4 = vector.load %arg6[%c0_4, %c0_5] : memref<1x256xf32, #tpu.memory_space<vmem>>, vector<1x256xf32>
    %5 = vector.broadcast %4 : vector<1x256xf32> to vector<64x256xf32>
    %6 = arith.addf %3, %5 : vector<64x256xf32>
    %7 = vector.shape_cast %6 : vector<64x256xf32> to vector<8x8x256xf32>
    %c0_6 = arith.constant 0 : index
    %c0_7 = arith.constant 0 : index
    %c0_8 = arith.constant 0 : index
    %8 = vector.load %arg2[%c0_6, %c0_7, %c0_8] : memref<8x8x1xf32, #tpu.memory_space<vmem>>, vector<8x8x1xf32>
    %c0_9 = arith.constant 0 : index
    %c0_10 = arith.constant 0 : index
    %9 = vector.load %arg4[%c0_9, %c0_10] : memref<32x128xf32, #tpu.memory_space<vmem>>, vector<32x128xf32>
    %c0_11 = arith.constant 0 : index
    %c0_12 = arith.constant 0 : index
    %10 = vector.load %arg5[%c0_11, %c0_12] : memref<32x128xf32, #tpu.memory_space<vmem>>, vector<32x128xf32>
    %cst_13 = arith.constant 0.000000e+00 : f32
    %11 = vector.broadcast %cst_13 : f32 to vector<8x32xf32>
    %12 = vector.extract_strided_slice %7 {offsets = [0, 0, 0], sizes = [1, 8, 128], strides = [1, 1, 1]} : vector<8x8x256xf32> to vector<1x8x128xf32>
    %13 = vector.shape_cast %12 : vector<1x8x128xf32> to vector<8x128xf32>
    %cst_14 = arith.constant dense<0.000000e+00> : vector<8x128xf32>
    %14 = tpu.matmul %11, %9, %cst_14 {dimension_numbers = #tpu.dot_dimension_numbers<[1], [0], [0], [1], [0, 0, 1, 1], [], []>} : vector<8x32xf32>, vector<32x128xf32>, vector<8x128xf32> -> vector<8x128xf32>
    %15 = arith.addf %13, %14 : vector<8x128xf32>
    %16 = vector.extract_strided_slice %7 {offsets = [7, 0, 128], sizes = [1, 8, 128], strides = [1, 1, 1]} : vector<8x8x256xf32> to vector<1x8x128xf32>
    %17 = vector.shape_cast %16 : vector<1x8x128xf32> to vector<8x128xf32>
    %cst_15 = arith.constant dense<0.000000e+00> : vector<8x128xf32>
    %18 = tpu.matmul %11, %10, %cst_15 {dimension_numbers = #tpu.dot_dimension_numbers<[1], [0], [0], [1], [0, 0, 1, 1], [], []>} : vector<8x32xf32>, vector<32x128xf32>, vector<8x128xf32> -> vector<8x128xf32>
    %19 = arith.addf %17, %18 : vector<8x128xf32>
    %20 = vector.extract_strided_slice %8 {offsets = [0, 0, 0], sizes = [1, 8, 1], strides = [1, 1, 1]} : vector<8x8x1xf32> to vector<1x8x1xf32>
    %21 = vector.shape_cast %20 : vector<1x8x1xf32> to vector<8x1xf32>
    %22 = vector.extract_strided_slice %8 {offsets = [7, 0, 0], sizes = [1, 8, 1], strides = [1, 1, 1]} : vector<8x8x1xf32> to vector<1x8x1xf32>
    %23 = vector.shape_cast %22 : vector<1x8x1xf32> to vector<8x1xf32>
    %24 = vector.extract_strided_slice %15 {offsets = [0, 0], sizes = [8, 32], strides = [1, 1]} : vector<8x128xf32> to vector<8x32xf32>
    %25 = arith.negf %24 : vector<8x32xf32>
    %26 = math.exp %25 : vector<8x32xf32>
    %cst_16 = arith.constant 1.000000e+00 : f32
    %27 = vector.broadcast %cst_16 : f32 to vector<8x32xf32>
    %28 = arith.addf %27, %26 : vector<8x32xf32>
    %29 = arith.divf %27, %28 : vector<8x32xf32>
    %30 = vector.extract_strided_slice %15 {offsets = [0, 32], sizes = [8, 32], strides = [1, 1]} : vector<8x128xf32> to vector<8x32xf32>
    %31 = arith.negf %30 : vector<8x32xf32>
    %32 = math.exp %31 : vector<8x32xf32>
    %cst_17 = arith.constant 1.000000e+00 : f32
    %33 = vector.broadcast %cst_17 : f32 to vector<8x32xf32>
    %34 = arith.addf %33, %32 : vector<8x32xf32>
    %35 = arith.divf %33, %34 : vector<8x32xf32>
    %36 = vector.extract_strided_slice %15 {offsets = [0, 64], sizes = [8, 32], strides = [1, 1]} : vector<8x128xf32> to vector<8x32xf32>
    %37 = math.tanh %36 : vector<8x32xf32>
    %38 = vector.extract_strided_slice %15 {offsets = [0, 96], sizes = [8, 32], strides = [1, 1]} : vector<8x128xf32> to vector<8x32xf32>
    %39 = arith.negf %38 : vector<8x32xf32>
    %40 = math.exp %39 : vector<8x32xf32>
    %cst_18 = arith.constant 1.000000e+00 : f32
    %41 = vector.broadcast %cst_18 : f32 to vector<8x32xf32>
    %42 = arith.addf %41, %40 : vector<8x32xf32>
    %43 = arith.divf %41, %42 : vector<8x32xf32>
    %44 = arith.mulf %35, %11 : vector<8x32xf32>
    %45 = arith.mulf %29, %37 : vector<8x32xf32>
    %46 = arith.addf %44, %45 : vector<8x32xf32>
    %47 = math.tanh %46 : vector<8x32xf32>
    %48 = arith.mulf %43, %47 : vector<8x32xf32>
    %49 = vector.extract_strided_slice %19 {offsets = [0, 0], sizes = [8, 32], strides = [1, 1]} : vector<8x128xf32> to vector<8x32xf32>
    %50 = arith.negf %49 : vector<8x32xf32>
    %51 = math.exp %50 : vector<8x32xf32>
    %cst_19 = arith.constant 1.000000e+00 : f32
    %52 = vector.broadcast %cst_19 : f32 to vector<8x32xf32>
    %53 = arith.addf %52, %51 : vector<8x32xf32>
    %54 = arith.divf %52, %53 : vector<8x32xf32>
    %55 = vector.extract_strided_slice %19 {offsets = [0, 32], sizes = [8, 32], strides = [1, 1]} : vector<8x128xf32> to vector<8x32xf32>
    %56 = arith.negf %55 : vector<8x32xf32>
    %57 = math.exp %56 : vector<8x32xf32>
    %cst_20 = arith.constant 1.000000e+00 : f32
    %58 = vector.broadcast %cst_20 : f32 to vector<8x32xf32>
    %59 = arith.addf %58, %57 : vector<8x32xf32>
    %60 = arith.divf %58, %59 : vector<8x32xf32>
    %61 = vector.extract_strided_slice %19 {offsets = [0, 64], sizes = [8, 32], strides = [1, 1]} : vector<8x128xf32> to vector<8x32xf32>
    %62 = math.tanh %61 : vector<8x32xf32>
    %63 = vector.extract_strided_slice %19 {offsets = [0, 96], sizes = [8, 32], strides = [1, 1]} : vector<8x128xf32> to vector<8x32xf32>
    %64 = arith.negf %63 : vector<8x32xf32>
    %65 = math.exp %64 : vector<8x32xf32>
    %cst_21 = arith.constant 1.000000e+00 : f32
    %66 = vector.broadcast %cst_21 : f32 to vector<8x32xf32>
    %67 = arith.addf %66, %65 : vector<8x32xf32>
    %68 = arith.divf %66, %67 : vector<8x32xf32>
    %69 = arith.mulf %60, %11 : vector<8x32xf32>
    %70 = arith.mulf %54, %62 : vector<8x32xf32>
    %71 = arith.addf %69, %70 : vector<8x32xf32>
    %72 = math.tanh %71 : vector<8x32xf32>
    %73 = arith.mulf %68, %72 : vector<8x32xf32>
    %74 = vector.broadcast %21 : vector<8x1xf32> to vector<8x32xf32>
    %75 = arith.mulf %74, %48 : vector<8x32xf32>
    %c0_22 = arith.constant 0 : index
    %c0_23 = arith.constant 0 : index
    %c0_24 = arith.constant 0 : index
    %76 = vector.load %arg12[%c0_22, %c0_23, %c0_24] : memref<8x8x64xf32, #tpu.memory_space<vmem>>, vector<1x8x32xf32>
    %77 = vector.shape_cast %76 : vector<1x8x32xf32> to vector<8x32xf32>
    %78 = vector.shape_cast %75 : vector<8x32xf32> to vector<1x8x32xf32>
    tpu.vector_store %arg12[%c0_22, %c0_23, %c0_24], %78 {strides = array<i32>} : memref<8x8x64xf32, #tpu.memory_space<vmem>>, vector<1x8x32xf32>,
    %79 = vector.broadcast %23 : vector<8x1xf32> to vector<8x32xf32>
    %80 = arith.mulf %79, %73 : vector<8x32xf32>
    %c7 = arith.constant 7 : index
    %c0_25 = arith.constant 0 : index
    %c32 = arith.constant 32 : index
    %81 = vector.load %arg12[%c7, %c0_25, %c32] : memref<8x8x64xf32, #tpu.memory_space<vmem>>, vector<1x8x32xf32>
    %82 = vector.shape_cast %81 : vector<1x8x32xf32> to vector<8x32xf32>
    %83 = vector.shape_cast %80 : vector<8x32xf32> to vector<1x8x32xf32>
    tpu.vector_store %arg12[%c7, %c0_25, %c32], %83 {strides = array<i32>} : memref<8x8x64xf32, #tpu.memory_space<vmem>>, vector<1x8x32xf32>,
    %84 = vector.broadcast %21 : vector<8x1xf32> to vector<8x32xf32>
    %85 = arith.mulf %84, %48 : vector<8x32xf32>
    %cst_26 = arith.constant 1.000000e+00 : f32
    %86 = vector.broadcast %cst_26 : f32 to vector<8x1xf32>
    %87 = arith.subf %86, %21 : vector<8x1xf32>
    %88 = vector.broadcast %87 : vector<8x1xf32> to vector<8x32xf32>
    %89 = arith.mulf %88, %11 : vector<8x32xf32>
    %90 = arith.addf %85, %89 : vector<8x32xf32>
    %91 = vector.broadcast %21 : vector<8x1xf32> to vector<8x32xf32>
    %92 = arith.mulf %91, %46 : vector<8x32xf32>
    %cst_27 = arith.constant 1.000000e+00 : f32
    %93 = vector.broadcast %cst_27 : f32 to vector<8x1xf32>
    %94 = arith.subf %93, %21 : vector<8x1xf32>
    %95 = vector.broadcast %94 : vector<8x1xf32> to vector<8x32xf32>
    %96 = arith.mulf %95, %11 : vector<8x32xf32>
    %97 = arith.addf %92, %96 : vector<8x32xf32>
    %98 = vector.broadcast %23 : vector<8x1xf32> to vector<8x32xf32>
    %99 = arith.mulf %98, %73 : vector<8x32xf32>
    %cst_28 = arith.constant 1.000000e+00 : f32
    %100 = vector.broadcast %cst_28 : f32 to vector<8x1xf32>
    %101 = arith.subf %100, %23 : vector<8x1xf32>
    %102 = vector.broadcast %101 : vector<8x1xf32> to vector<8x32xf32>
    %103 = arith.mulf %102, %11 : vector<8x32xf32>
    %104 = arith.addf %99, %103 : vector<8x32xf32>
    %105 = vector.broadcast %23 : vector<8x1xf32> to vector<8x32xf32>
    %106 = arith.mulf %105, %71 : vector<8x32xf32>
    %cst_29 = arith.constant 1.000000e+00 : f32
    %107 = vector.broadcast %cst_29 : f32 to vector<8x1xf32>
    %108 = arith.subf %107, %23 : vector<8x1xf32>
    %109 = vector.broadcast %108 : vector<8x1xf32> to vector<8x32xf32>
    %110 = arith.mulf %109, %11 : vector<8x32xf32>
    %111 = arith.addf %106, %110 : vector<8x32xf32>
    %112 = vector.extract_strided_slice %7 {offsets = [1, 0, 0], sizes = [1, 8, 128], strides = [1, 1, 1]} : vector<8x8x256xf32> to vector<1x8x128xf32>
    %113 = vector.shape_cast %112 : vector<1x8x128xf32> to vector<8x128xf32>
    %cst_30 = arith.constant dense<0.000000e+00> : vector<8x128xf32>
    %114 = tpu.matmul %90, %9, %cst_30 {dimension_numbers = #tpu.dot_dimension_numbers<[1], [0], [0], [1], [0, 0, 1, 1], [], []>} : vector<8x32xf32>, vector<32x128xf32>, vector<8x128xf32> -> vector<8x128xf32>
    %115 = arith.addf %113, %114 : vector<8x128xf32>
    %116 = vector.extract_strided_slice %7 {offsets = [6, 0, 128], sizes = [1, 8, 128], strides = [1, 1, 1]} : vector<8x8x256xf32> to vector<1x8x128xf32>
    %117 = vector.shape_cast %116 : vector<1x8x128xf32> to vector<8x128xf32>
    %cst_31 = arith.constant dense<0.000000e+00> : vector<8x128xf32>
    %118 = tpu.matmul %104, %10, %cst_31 {dimension_numbers = #tpu.dot_dimension_numbers<[1], [0], [0], [1], [0, 0, 1, 1], [], []>} : vector<8x32xf32>, vector<32x128xf32>, vector<8x128xf32> -> vector<8x128xf32>
    %119 = arith.addf %117, %118 : vector<8x128xf32>
    %120 = vector.extract_strided_slice %8 {offsets = [1, 0, 0], sizes = [1, 8, 1], strides = [1, 1, 1]} : vector<8x8x1xf32> to vector<1x8x1xf32>
    %121 = vector.shape_cast %120 : vector<1x8x1xf32> to vector<8x1xf32>
    %122 = vector.extract_strided_slice %8 {offsets = [6, 0, 0], sizes = [1, 8, 1], strides = [1, 1, 1]} : vector<8x8x1xf32> to vector<1x8x1xf32>
    %123 = vector.shape_cast %122 : vector<1x8x1xf32> to vector<8x1xf32>
    %124 = vector.extract_strided_slice %115 {offsets = [0, 0], sizes = [8, 32], strides = [1, 1]} : vector<8x128xf32> to vector<8x32xf32>
    %125 = arith.negf %124 : vector<8x32xf32>
    %126 = math.exp %125 : vector<8x32xf32>
    %cst_32 = arith.constant 1.000000e+00 : f32
    %127 = vector.broadcast %cst_32 : f32 to vector<8x32xf32>
    %128 = arith.addf %127, %126 : vector<8x32xf32>
    %129 = arith.divf %127, %128 : vector<8x32xf32>
    %130 = vector.extract_strided_slice %115 {offsets = [0, 32], sizes = [8, 32], strides = [1, 1]} : vector<8x128xf32> to vector<8x32xf32>
    %131 = arith.negf %130 : vector<8x32xf32>
    %132 = math.exp %131 : vector<8x32xf32>
    %cst_33 = arith.constant 1.000000e+00 : f32
    %133 = vector.broadcast %cst_33 : f32 to vector<8x32xf32>
    %134 = arith.addf %133, %132 : vector<8x32xf32>
    %135 = arith.divf %133, %134 : vector<8x32xf32>
    %136 = vector.extract_strided_slice %115 {offsets = [0, 64], sizes = [8, 32], strides = [1, 1]} : vector<8x128xf32> to vector<8x32xf32>
    %137 = math.tanh %136 : vector<8x32xf32>
    %138 = vector.extract_strided_slice %115 {offsets = [0, 96], sizes = [8, 32], strides = [1, 1]} : vector<8x128xf32> to vector<8x32xf32>
    %139 = arith.negf %138 : vector<8x32xf32>
    %140 = math.exp %139 : vector<8x32xf32>
    %cst_34 = arith.constant 1.000000e+00 : f32
    %141 = vector.broadcast %cst_34 : f32 to vector<8x32xf32>
    %142 = arith.addf %141, %140 : vector<8x32xf32>
    %143 = arith.divf %141, %142 : vector<8x32xf32>
    %144 = arith.mulf %135, %97 : vector<8x32xf32>
    %145 = arith.mulf %129, %137 : vector<8x32xf32>
    %146 = arith.addf %144, %145 : vector<8x32xf32>
    %147 = math.tanh %146 : vector<8x32xf32>
    %148 = arith.mulf %143, %147 : vector<8x32xf32>
    %149 = vector.extract_strided_slice %119 {offsets = [0, 0], sizes = [8, 32], strides = [1, 1]} : vector<8x128xf32> to vector<8x32xf32>
    %150 = arith.negf %149 : vector<8x32xf32>
    %151 = math.exp %150 : vector<8x32xf32>
    %cst_35 = arith.constant 1.000000e+00 : f32
    %152 = vector.broadcast %cst_35 : f32 to vector<8x32xf32>
    %153 = arith.addf %152, %151 : vector<8x32xf32>
    %154 = arith.divf %152, %153 : vector<8x32xf32>
    %155 = vector.extract_strided_slice %119 {offsets = [0, 32], sizes = [8, 32], strides = [1, 1]} : vector<8x128xf32> to vector<8x32xf32>
    %156 = arith.negf %155 : vector<8x32xf32>
    %157 = math.exp %156 : vector<8x32xf32>
    %cst_36 = arith.constant 1.000000e+00 : f32
    %158 = vector.broadcast %cst_36 : f32 to vector<8x32xf32>
    %159 = arith.addf %158, %157 : vector<8x32xf32>
    %160 = arith.divf %158, %159 : vector<8x32xf32>
    %161 = vector.extract_strided_slice %119 {offsets = [0, 64], sizes = [8, 32], strides = [1, 1]} : vector<8x128xf32> to vector<8x32xf32>
    %162 = math.tanh %161 : vector<8x32xf32>
    %163 = vector.extract_strided_slice %119 {offsets = [0, 96], sizes = [8, 32], strides = [1, 1]} : vector<8x128xf32> to vector<8x32xf32>
    %164 = arith.negf %163 : vector<8x32xf32>
    %165 = math.exp %164 : vector<8x32xf32>
    %cst_37 = arith.constant 1.000000e+00 : f32
    %166 = vector.broadcast %cst_37 : f32 to vector<8x32xf32>
    %167 = arith.addf %166, %165 : vector<8x32xf32>
    %168 = arith.divf %166, %167 : vector<8x32xf32>
    %169 = arith.mulf %160, %111 : vector<8x32xf32>
    %170 = arith.mulf %154, %162 : vector<8x32xf32>
    %171 = arith.addf %169, %170 : vector<8x32xf32>
    %172 = math.tanh %171 : vector<8x32xf32>
    %173 = arith.mulf %168, %172 : vector<8x32xf32>
    %174 = vector.broadcast %121 : vector<8x1xf32> to vector<8x32xf32>
    %175 = arith.mulf %174, %148 : vector<8x32xf32>
    %c1 = arith.constant 1 : index
    %c0_38 = arith.constant 0 : index
    %c0_39 = arith.constant 0 : index
    %176 = vector.load %arg12[%c1, %c0_38, %c0_39] : memref<8x8x64xf32, #tpu.memory_space<vmem>>, vector<1x8x32xf32>
    %177 = vector.shape_cast %176 : vector<1x8x32xf32> to vector<8x32xf32>
    %178 = vector.shape_cast %175 : vector<8x32xf32> to vector<1x8x32xf32>
    tpu.vector_store %arg12[%c1, %c0_38, %c0_39], %178 {strides = array<i32>} : memref<8x8x64xf32, #tpu.memory_space<vmem>>, vector<1x8x32xf32>,
    %179 = vector.broadcast %123 : vector<8x1xf32> to vector<8x32xf32>
    %180 = arith.mulf %179, %173 : vector<8x32xf32>
    %c6 = arith.constant 6 : index
    %c0_40 = arith.constant 0 : index
    %c32_41 = arith.constant 32 : index
    %181 = vector.load %arg12[%c6, %c0_40, %c32_41] : memref<8x8x64xf32, #tpu.memory_space<vmem>>, vector<1x8x32xf32>
    %182 = vector.shape_cast %181 : vector<1x8x32xf32> to vector<8x32xf32>
    %183 = vector.shape_cast %180 : vector<8x32xf32> to vector<1x8x32xf32>
    tpu.vector_store %arg12[%c6, %c0_40, %c32_41], %183 {strides = array<i32>} : memref<8x8x64xf32, #tpu.memory_space<vmem>>, vector<1x8x32xf32>,
    %184 = vector.broadcast %121 : vector<8x1xf32> to vector<8x32xf32>
    %185 = arith.mulf %184, %148 : vector<8x32xf32>
    %cst_42 = arith.constant 1.000000e+00 : f32
    %186 = vector.broadcast %cst_42 : f32 to vector<8x1xf32>
    %187 = arith.subf %186, %121 : vector<8x1xf32>
    %188 = vector.broadcast %187 : vector<8x1xf32> to vector<8x32xf32>
    %189 = arith.mulf %188, %90 : vector<8x32xf32>
    %190 = arith.addf %185, %189 : vector<8x32xf32>
    %191 = vector.broadcast %121 : vector<8x1xf32> to vector<8x32xf32>
    %192 = arith.mulf %191, %146 : vector<8x32xf32>
    %cst_43 = arith.constant 1.000000e+00 : f32
    %193 = vector.broadcast %cst_43 : f32 to vector<8x1xf32>
    %194 = arith.subf %193, %121 : vector<8x1xf32>
    %195 = vector.broadcast %194 : vector<8x1xf32> to vector<8x32xf32>
    %196 = arith.mulf %195, %97 : vector<8x32xf32>
    %197 = arith.addf %192, %196 : vector<8x32xf32>
    %198 = vector.broadcast %123 : vector<8x1xf32> to vector<8x32xf32>
    %199 = arith.mulf %198, %173 : vector<8x32xf32>
    %cst_44 = arith.constant 1.000000e+00 : f32
    %200 = vector.broadcast %cst_44 : f32 to vector<8x1xf32>
    %201 = arith.subf %200, %123 : vector<8x1xf32>
    %202 = vector.broadcast %201 : vector<8x1xf32> to vector<8x32xf32>
    %203 = arith.mulf %202, %104 : vector<8x32xf32>
    %204 = arith.addf %199, %203 : vector<8x32xf32>
    %205 = vector.broadcast %123 : vector<8x1xf32> to vector<8x32xf32>
    %206 = arith.mulf %205, %171 : vector<8x32xf32>
    %cst_45 = arith.constant 1.000000e+00 : f32
    %207 = vector.broadcast %cst_45 : f32 to vector<8x1xf32>
    %208 = arith.subf %207, %123 : vector<8x1xf32>
    %209 = vector.broadcast %208 : vector<8x1xf32> to vector<8x32xf32>
    %210 = arith.mulf %209, %111 : vector<8x32xf32>
    %211 = arith.addf %206, %210 : vector<8x32xf32>
    %212 = vector.extract_strided_slice %7 {offsets = [2, 0, 0], sizes = [1, 8, 128], strides = [1, 1, 1]} : vector<8x8x256xf32> to vector<1x8x128xf32>
    %213 = vector.shape_cast %212 : vector<1x8x128xf32> to vector<8x128xf32>
    %cst_46 = arith.constant dense<0.000000e+00> : vector<8x128xf32>
    %214 = tpu.matmul %190, %9, %cst_46 {dimension_numbers = #tpu.dot_dimension_numbers<[1], [0], [0], [1], [0, 0, 1, 1], [], []>} : vector<8x32xf32>, vector<32x128xf32>, vector<8x128xf32> -> vector<8x128xf32>
    %215 = arith.addf %213, %214 : vector<8x128xf32>
    %216 = vector.extract_strided_slice %7 {offsets = [5, 0, 128], sizes = [1, 8, 128], strides = [1, 1, 1]} : vector<8x8x256xf32> to vector<1x8x128xf32>
    %217 = vector.shape_cast %216 : vector<1x8x128xf32> to vector<8x128xf32>
    %cst_47 = arith.constant dense<0.000000e+00> : vector<8x128xf32>
    %218 = tpu.matmul %204, %10, %cst_47 {dimension_numbers = #tpu.dot_dimension_numbers<[1], [0], [0], [1], [0, 0, 1, 1], [], []>} : vector<8x32xf32>, vector<32x128xf32>, vector<8x128xf32> -> vector<8x128xf32>
    %219 = arith.addf %217, %218 : vector<8x128xf32>
    %220 = vector.extract_strided_slice %8 {offsets = [2, 0, 0], sizes = [1, 8, 1], strides = [1, 1, 1]} : vector<8x8x1xf32> to vector<1x8x1xf32>
    %221 = vector.shape_cast %220 : vector<1x8x1xf32> to vector<8x1xf32>
    %222 = vector.extract_strided_slice %8 {offsets = [5, 0, 0], sizes = [1, 8, 1], strides = [1, 1, 1]} : vector<8x8x1xf32> to vector<1x8x1xf32>
    %223 = vector.shape_cast %222 : vector<1x8x1xf32> to vector<8x1xf32>
    %224 = vector.extract_strided_slice %215 {offsets = [0, 0], sizes = [8, 32], strides = [1, 1]} : vector<8x128xf32> to vector<8x32xf32>
    %225 = arith.negf %224 : vector<8x32xf32>
    %226 = math.exp %225 : vector<8x32xf32>
    %cst_48 = arith.constant 1.000000e+00 : f32
    %227 = vector.broadcast %cst_48 : f32 to vector<8x32xf32>
    %228 = arith.addf %227, %226 : vector<8x32xf32>
    %229 = arith.divf %227, %228 : vector<8x32xf32>
    %230 = vector.extract_strided_slice %215 {offsets = [0, 32], sizes = [8, 32], strides = [1, 1]} : vector<8x128xf32> to vector<8x32xf32>
    %231 = arith.negf %230 : vector<8x32xf32>
    %232 = math.exp %231 : vector<8x32xf32>
    %cst_49 = arith.constant 1.000000e+00 : f32
    %233 = vector.broadcast %cst_49 : f32 to vector<8x32xf32>
    %234 = arith.addf %233, %232 : vector<8x32xf32>
    %235 = arith.divf %233, %234 : vector<8x32xf32>
    %236 = vector.extract_strided_slice %215 {offsets = [0, 64], sizes = [8, 32], strides = [1, 1]} : vector<8x128xf32> to vector<8x32xf32>
    %237 = math.tanh %236 : vector<8x32xf32>
    %238 = vector.extract_strided_slice %215 {offsets = [0, 96], sizes = [8, 32], strides = [1, 1]} : vector<8x128xf32> to vector<8x32xf32>
    %239 = arith.negf %238 : vector<8x32xf32>
    %240 = math.exp %239 : vector<8x32xf32>
    %cst_50 = arith.constant 1.000000e+00 : f32
    %241 = vector.broadcast %cst_50 : f32 to vector<8x32xf32>
    %242 = arith.addf %241, %240 : vector<8x32xf32>
    %243 = arith.divf %241, %242 : vector<8x32xf32>
    %244 = arith.mulf %235, %197 : vector<8x32xf32>
    %245 = arith.mulf %229, %237 : vector<8x32xf32>
    %246 = arith.addf %244, %245 : vector<8x32xf32>
    %247 = math.tanh %246 : vector<8x32xf32>
    %248 = arith.mulf %243, %247 : vector<8x32xf32>
    %249 = vector.extract_strided_slice %219 {offsets = [0, 0], sizes = [8, 32], strides = [1, 1]} : vector<8x128xf32> to vector<8x32xf32>
    %250 = arith.negf %249 : vector<8x32xf32>
    %251 = math.exp %250 : vector<8x32xf32>
    %cst_51 = arith.constant 1.000000e+00 : f32
    %252 = vector.broadcast %cst_51 : f32 to vector<8x32xf32>
    %253 = arith.addf %252, %251 : vector<8x32xf32>
    %254 = arith.divf %252, %253 : vector<8x32xf32>
    %255 = vector.extract_strided_slice %219 {offsets = [0, 32], sizes = [8, 32], strides = [1, 1]} : vector<8x128xf32> to vector<8x32xf32>
    %256 = arith.negf %255 : vector<8x32xf32>
    %257 = math.exp %256 : vector<8x32xf32>
    %cst_52 = arith.constant 1.000000e+00 : f32
    %258 = vector.broadcast %cst_52 : f32 to vector<8x32xf32>
    %259 = arith.addf %258, %257 : vector<8x32xf32>
    %260 = arith.divf %258, %259 : vector<8x32xf32>
    %261 = vector.extract_strided_slice %219 {offsets = [0, 64], sizes = [8, 32], strides = [1, 1]} : vector<8x128xf32> to vector<8x32xf32>
    %262 = math.tanh %261 : vector<8x32xf32>
    %263 = vector.extract_strided_slice %219 {offsets = [0, 96], sizes = [8, 32], strides = [1, 1]} : vector<8x128xf32> to vector<8x32xf32>
    %264 = arith.negf %263 : vector<8x32xf32>
    %265 = math.exp %264 : vector<8x32xf32>
    %cst_53 = arith.constant 1.000000e+00 : f32
    %266 = vector.broadcast %cst_53 : f32 to vector<8x32xf32>
    %267 = arith.addf %266, %265 : vector<8x32xf32>
    %268 = arith.divf %266, %267 : vector<8x32xf32>
    %269 = arith.mulf %260, %211 : vector<8x32xf32>
    %270 = arith.mulf %254, %262 : vector<8x32xf32>
    %271 = arith.addf %269, %270 : vector<8x32xf32>
    %272 = math.tanh %271 : vector<8x32xf32>
    %273 = arith.mulf %268, %272 : vector<8x32xf32>
    %274 = vector.broadcast %221 : vector<8x1xf32> to vector<8x32xf32>
    %275 = arith.mulf %274, %248 : vector<8x32xf32>
    %c2 = arith.constant 2 : index
    %c0_54 = arith.constant 0 : index
    %c0_55 = arith.constant 0 : index
    %276 = vector.load %arg12[%c2, %c0_54, %c0_55] : memref<8x8x64xf32, #tpu.memory_space<vmem>>, vector<1x8x32xf32>
    %277 = vector.shape_cast %276 : vector<1x8x32xf32> to vector<8x32xf32>
    %278 = vector.shape_cast %275 : vector<8x32xf32> to vector<1x8x32xf32>
    tpu.vector_store %arg12[%c2, %c0_54, %c0_55], %278 {strides = array<i32>} : memref<8x8x64xf32, #tpu.memory_space<vmem>>, vector<1x8x32xf32>,
    %279 = vector.broadcast %223 : vector<8x1xf32> to vector<8x32xf32>
    %280 = arith.mulf %279, %273 : vector<8x32xf32>
    %c5 = arith.constant 5 : index
    %c0_56 = arith.constant 0 : index
    %c32_57 = arith.constant 32 : index
    %281 = vector.load %arg12[%c5, %c0_56, %c32_57] : memref<8x8x64xf32, #tpu.memory_space<vmem>>, vector<1x8x32xf32>
    %282 = vector.shape_cast %281 : vector<1x8x32xf32> to vector<8x32xf32>
    %283 = vector.shape_cast %280 : vector<8x32xf32> to vector<1x8x32xf32>
    tpu.vector_store %arg12[%c5, %c0_56, %c32_57], %283 {strides = array<i32>} : memref<8x8x64xf32, #tpu.memory_space<vmem>>, vector<1x8x32xf32>,
    %284 = vector.broadcast %221 : vector<8x1xf32> to vector<8x32xf32>
    %285 = arith.mulf %284, %248 : vector<8x32xf32>
    %cst_58 = arith.constant 1.000000e+00 : f32
    %286 = vector.broadcast %cst_58 : f32 to vector<8x1xf32>
    %287 = arith.subf %286, %221 : vector<8x1xf32>
    %288 = vector.broadcast %287 : vector<8x1xf32> to vector<8x32xf32>
    %289 = arith.mulf %288, %190 : vector<8x32xf32>
    %290 = arith.addf %285, %289 : vector<8x32xf32>
    %291 = vector.broadcast %221 : vector<8x1xf32> to vector<8x32xf32>
    %292 = arith.mulf %291, %246 : vector<8x32xf32>
    %cst_59 = arith.constant 1.000000e+00 : f32
    %293 = vector.broadcast %cst_59 : f32 to vector<8x1xf32>
    %294 = arith.subf %293, %221 : vector<8x1xf32>
    %295 = vector.broadcast %294 : vector<8x1xf32> to vector<8x32xf32>
    %296 = arith.mulf %295, %197 : vector<8x32xf32>
    %297 = arith.addf %292, %296 : vector<8x32xf32>
    %298 = vector.broadcast %223 : vector<8x1xf32> to vector<8x32xf32>
    %299 = arith.mulf %298, %273 : vector<8x32xf32>
    %cst_60 = arith.constant 1.000000e+00 : f32
    %300 = vector.broadcast %cst_60 : f32 to vector<8x1xf32>
    %301 = arith.subf %300, %223 : vector<8x1xf32>
    %302 = vector.broadcast %301 : vector<8x1xf32> to vector<8x32xf32>
    %303 = arith.mulf %302, %204 : vector<8x32xf32>
    %304 = arith.addf %299, %303 : vector<8x32xf32>
    %305 = vector.broadcast %223 : vector<8x1xf32> to vector<8x32xf32>
    %306 = arith.mulf %305, %271 : vector<8x32xf32>
    %cst_61 = arith.constant 1.000000e+00 : f32
    %307 = vector.broadcast %cst_61 : f32 to vector<8x1xf32>
    %308 = arith.subf %307, %223 : vector<8x1xf32>
    %309 = vector.broadcast %308 : vector<8x1xf32> to vector<8x32xf32>
    %310 = arith.mulf %309, %211 : vector<8x32xf32>
    %311 = arith.addf %306, %310 : vector<8x32xf32>
    %312 = vector.extract_strided_slice %7 {offsets = [3, 0, 0], sizes = [1, 8, 128], strides = [1, 1, 1]} : vector<8x8x256xf32> to vector<1x8x128xf32>
    %313 = vector.shape_cast %312 : vector<1x8x128xf32> to vector<8x128xf32>
    %cst_62 = arith.constant dense<0.000000e+00> : vector<8x128xf32>
    %314 = tpu.matmul %290, %9, %cst_62 {dimension_numbers = #tpu.dot_dimension_numbers<[1], [0], [0], [1], [0, 0, 1, 1], [], []>} : vector<8x32xf32>, vector<32x128xf32>, vector<8x128xf32> -> vector<8x128xf32>
    %315 = arith.addf %313, %314 : vector<8x128xf32>
    %316 = vector.extract_strided_slice %7 {offsets = [4, 0, 128], sizes = [1, 8, 128], strides = [1, 1, 1]} : vector<8x8x256xf32> to vector<1x8x128xf32>
    %317 = vector.shape_cast %316 : vector<1x8x128xf32> to vector<8x128xf32>
    %cst_63 = arith.constant dense<0.000000e+00> : vector<8x128xf32>
    %318 = tpu.matmul %304, %10, %cst_63 {dimension_numbers = #tpu.dot_dimension_numbers<[1], [0], [0], [1], [0, 0, 1, 1], [], []>} : vector<8x32xf32>, vector<32x128xf32>, vector<8x128xf32> -> vector<8x128xf32>
    %319 = arith.addf %317, %318 : vector<8x128xf32>
    %320 = vector.extract_strided_slice %8 {offsets = [3, 0, 0], sizes = [1, 8, 1], strides = [1, 1, 1]} : vector<8x8x1xf32> to vector<1x8x1xf32>
    %321 = vector.shape_cast %320 : vector<1x8x1xf32> to vector<8x1xf32>
    %322 = vector.extract_strided_slice %8 {offsets = [4, 0, 0], sizes = [1, 8, 1], strides = [1, 1, 1]} : vector<8x8x1xf32> to vector<1x8x1xf32>
    %323 = vector.shape_cast %322 : vector<1x8x1xf32> to vector<8x1xf32>
    %324 = vector.extract_strided_slice %315 {offsets = [0, 0], sizes = [8, 32], strides = [1, 1]} : vector<8x128xf32> to vector<8x32xf32>
    %325 = arith.negf %324 : vector<8x32xf32>
    %326 = math.exp %325 : vector<8x32xf32>
    %cst_64 = arith.constant 1.000000e+00 : f32
    %327 = vector.broadcast %cst_64 : f32 to vector<8x32xf32>
    %328 = arith.addf %327, %326 : vector<8x32xf32>
    %329 = arith.divf %327, %328 : vector<8x32xf32>
    %330 = vector.extract_strided_slice %315 {offsets = [0, 32], sizes = [8, 32], strides = [1, 1]} : vector<8x128xf32> to vector<8x32xf32>
    %331 = arith.negf %330 : vector<8x32xf32>
    %332 = math.exp %331 : vector<8x32xf32>
    %cst_65 = arith.constant 1.000000e+00 : f32
    %333 = vector.broadcast %cst_65 : f32 to vector<8x32xf32>
    %334 = arith.addf %333, %332 : vector<8x32xf32>
    %335 = arith.divf %333, %334 : vector<8x32xf32>
    %336 = vector.extract_strided_slice %315 {offsets = [0, 64], sizes = [8, 32], strides = [1, 1]} : vector<8x128xf32> to vector<8x32xf32>
    %337 = math.tanh %336 : vector<8x32xf32>
    %338 = vector.extract_strided_slice %315 {offsets = [0, 96], sizes = [8, 32], strides = [1, 1]} : vector<8x128xf32> to vector<8x32xf32>
    %339 = arith.negf %338 : vector<8x32xf32>
    %340 = math.exp %339 : vector<8x32xf32>
    %cst_66 = arith.constant 1.000000e+00 : f32
    %341 = vector.broadcast %cst_66 : f32 to vector<8x32xf32>
    %342 = arith.addf %341, %340 : vector<8x32xf32>
    %343 = arith.divf %341, %342 : vector<8x32xf32>
    %344 = arith.mulf %335, %297 : vector<8x32xf32>
    %345 = arith.mulf %329, %337 : vector<8x32xf32>
    %346 = arith.addf %344, %345 : vector<8x32xf32>
    %347 = math.tanh %346 : vector<8x32xf32>
    %348 = arith.mulf %343, %347 : vector<8x32xf32>
    %349 = vector.extract_strided_slice %319 {offsets = [0, 0], sizes = [8, 32], strides = [1, 1]} : vector<8x128xf32> to vector<8x32xf32>
    %350 = arith.negf %349 : vector<8x32xf32>
    %351 = math.exp %350 : vector<8x32xf32>
    %cst_67 = arith.constant 1.000000e+00 : f32
    %352 = vector.broadcast %cst_67 : f32 to vector<8x32xf32>
    %353 = arith.addf %352, %351 : vector<8x32xf32>
    %354 = arith.divf %352, %353 : vector<8x32xf32>
    %355 = vector.extract_strided_slice %319 {offsets = [0, 32], sizes = [8, 32], strides = [1, 1]} : vector<8x128xf32> to vector<8x32xf32>
    %356 = arith.negf %355 : vector<8x32xf32>
    %357 = math.exp %356 : vector<8x32xf32>
    %cst_68 = arith.constant 1.000000e+00 : f32
    %358 = vector.broadcast %cst_68 : f32 to vector<8x32xf32>
    %359 = arith.addf %358, %357 : vector<8x32xf32>
    %360 = arith.divf %358, %359 : vector<8x32xf32>
    %361 = vector.extract_strided_slice %319 {offsets = [0, 64], sizes = [8, 32], strides = [1, 1]} : vector<8x128xf32> to vector<8x32xf32>
    %362 = math.tanh %361 : vector<8x32xf32>
    %363 = vector.extract_strided_slice %319 {offsets = [0, 96], sizes = [8, 32], strides = [1, 1]} : vector<8x128xf32> to vector<8x32xf32>
    %364 = arith.negf %363 : vector<8x32xf32>
    %365 = math.exp %364 : vector<8x32xf32>
    %cst_69 = arith.constant 1.000000e+00 : f32
    %366 = vector.broadcast %cst_69 : f32 to vector<8x32xf32>
    %367 = arith.addf %366, %365 : vector<8x32xf32>
    %368 = arith.divf %366, %367 : vector<8x32xf32>
    %369 = arith.mulf %360, %311 : vector<8x32xf32>
    %370 = arith.mulf %354, %362 : vector<8x32xf32>
    %371 = arith.addf %369, %370 : vector<8x32xf32>
    %372 = math.tanh %371 : vector<8x32xf32>
    %373 = arith.mulf %368, %372 : vector<8x32xf32>
    %374 = vector.broadcast %321 : vector<8x1xf32> to vector<8x32xf32>
    %375 = arith.mulf %374, %348 : vector<8x32xf32>
    %c3 = arith.constant 3 : index
    %c0_70 = arith.constant 0 : index
    %c0_71 = arith.constant 0 : index
    %376 = vector.load %arg12[%c3, %c0_70, %c0_71] : memref<8x8x64xf32, #tpu.memory_space<vmem>>, vector<1x8x32xf32>
    %377 = vector.shape_cast %376 : vector<1x8x32xf32> to vector<8x32xf32>
    %378 = vector.shape_cast %375 : vector<8x32xf32> to vector<1x8x32xf32>
    tpu.vector_store %arg12[%c3, %c0_70, %c0_71], %378 {strides = array<i32>} : memref<8x8x64xf32, #tpu.memory_space<vmem>>, vector<1x8x32xf32>,
    %379 = vector.broadcast %323 : vector<8x1xf32> to vector<8x32xf32>
    %380 = arith.mulf %379, %373 : vector<8x32xf32>
    %c4 = arith.constant 4 : index
    %c0_72 = arith.constant 0 : index
    %c32_73 = arith.constant 32 : index
    %381 = vector.load %arg12[%c4, %c0_72, %c32_73] : memref<8x8x64xf32, #tpu.memory_space<vmem>>, vector<1x8x32xf32>
    %382 = vector.shape_cast %381 : vector<1x8x32xf32> to vector<8x32xf32>
    %383 = vector.shape_cast %380 : vector<8x32xf32> to vector<1x8x32xf32>
    tpu.vector_store %arg12[%c4, %c0_72, %c32_73], %383 {strides = array<i32>} : memref<8x8x64xf32, #tpu.memory_space<vmem>>, vector<1x8x32xf32>,
    %384 = vector.broadcast %321 : vector<8x1xf32> to vector<8x32xf32>
    %385 = arith.mulf %384, %348 : vector<8x32xf32>
    %cst_74 = arith.constant 1.000000e+00 : f32
    %386 = vector.broadcast %cst_74 : f32 to vector<8x1xf32>
    %387 = arith.subf %386, %321 : vector<8x1xf32>
    %388 = vector.broadcast %387 : vector<8x1xf32> to vector<8x32xf32>
    %389 = arith.mulf %388, %290 : vector<8x32xf32>
    %390 = arith.addf %385, %389 : vector<8x32xf32>
    %391 = vector.broadcast %321 : vector<8x1xf32> to vector<8x32xf32>
    %392 = arith.mulf %391, %346 : vector<8x32xf32>
    %cst_75 = arith.constant 1.000000e+00 : f32
    %393 = vector.broadcast %cst_75 : f32 to vector<8x1xf32>
    %394 = arith.subf %393, %321 : vector<8x1xf32>
    %395 = vector.broadcast %394 : vector<8x1xf32> to vector<8x32xf32>
    %396 = arith.mulf %395, %297 : vector<8x32xf32>
    %397 = arith.addf %392, %396 : vector<8x32xf32>
    %398 = vector.broadcast %323 : vector<8x1xf32> to vector<8x32xf32>
    %399 = arith.mulf %398, %373 : vector<8x32xf32>
    %cst_76 = arith.constant 1.000000e+00 : f32
    %400 = vector.broadcast %cst_76 : f32 to vector<8x1xf32>
    %401 = arith.subf %400, %323 : vector<8x1xf32>
    %402 = vector.broadcast %401 : vector<8x1xf32> to vector<8x32xf32>
    %403 = arith.mulf %402, %304 : vector<8x32xf32>
    %404 = arith.addf %399, %403 : vector<8x32xf32>
    %405 = vector.broadcast %323 : vector<8x1xf32> to vector<8x32xf32>
    %406 = arith.mulf %405, %371 : vector<8x32xf32>
    %cst_77 = arith.constant 1.000000e+00 : f32
    %407 = vector.broadcast %cst_77 : f32 to vector<8x1xf32>
    %408 = arith.subf %407, %323 : vector<8x1xf32>
    %409 = vector.broadcast %408 : vector<8x1xf32> to vector<8x32xf32>
    %410 = arith.mulf %409, %311 : vector<8x32xf32>
    %411 = arith.addf %406, %410 : vector<8x32xf32>
    %412 = vector.extract_strided_slice %7 {offsets = [4, 0, 0], sizes = [1, 8, 128], strides = [1, 1, 1]} : vector<8x8x256xf32> to vector<1x8x128xf32>
    %413 = vector.shape_cast %412 : vector<1x8x128xf32> to vector<8x128xf32>
    %cst_78 = arith.constant dense<0.000000e+00> : vector<8x128xf32>
    %414 = tpu.matmul %390, %9, %cst_78 {dimension_numbers = #tpu.dot_dimension_numbers<[1], [0], [0], [1], [0, 0, 1, 1], [], []>} : vector<8x32xf32>, vector<32x128xf32>, vector<8x128xf32> -> vector<8x128xf32>
    %415 = arith.addf %413, %414 : vector<8x128xf32>
    %416 = vector.extract_strided_slice %7 {offsets = [3, 0, 128], sizes = [1, 8, 128], strides = [1, 1, 1]} : vector<8x8x256xf32> to vector<1x8x128xf32>
    %417 = vector.shape_cast %416 : vector<1x8x128xf32> to vector<8x128xf32>
    %cst_79 = arith.constant dense<0.000000e+00> : vector<8x128xf32>
    %418 = tpu.matmul %404, %10, %cst_79 {dimension_numbers = #tpu.dot_dimension_numbers<[1], [0], [0], [1], [0, 0, 1, 1], [], []>} : vector<8x32xf32>, vector<32x128xf32>, vector<8x128xf32> -> vector<8x128xf32>
    %419 = arith.addf %417, %418 : vector<8x128xf32>
    %420 = vector.extract_strided_slice %8 {offsets = [4, 0, 0], sizes = [1, 8, 1], strides = [1, 1, 1]} : vector<8x8x1xf32> to vector<1x8x1xf32>
    %421 = vector.shape_cast %420 : vector<1x8x1xf32> to vector<8x1xf32>
    %422 = vector.extract_strided_slice %8 {offsets = [3, 0, 0], sizes = [1, 8, 1], strides = [1, 1, 1]} : vector<8x8x1xf32> to vector<1x8x1xf32>
    %423 = vector.shape_cast %422 : vector<1x8x1xf32> to vector<8x1xf32>
    %424 = vector.extract_strided_slice %415 {offsets = [0, 0], sizes = [8, 32], strides = [1, 1]} : vector<8x128xf32> to vector<8x32xf32>
    %425 = arith.negf %424 : vector<8x32xf32>
    %426 = math.exp %425 : vector<8x32xf32>
    %cst_80 = arith.constant 1.000000e+00 : f32
    %427 = vector.broadcast %cst_80 : f32 to vector<8x32xf32>
    %428 = arith.addf %427, %426 : vector<8x32xf32>
    %429 = arith.divf %427, %428 : vector<8x32xf32>
    %430 = vector.extract_strided_slice %415 {offsets = [0, 32], sizes = [8, 32], strides = [1, 1]} : vector<8x128xf32> to vector<8x32xf32>
    %431 = arith.negf %430 : vector<8x32xf32>
    %432 = math.exp %431 : vector<8x32xf32>
    %cst_81 = arith.constant 1.000000e+00 : f32
    %433 = vector.broadcast %cst_81 : f32 to vector<8x32xf32>
    %434 = arith.addf %433, %432 : vector<8x32xf32>
    %435 = arith.divf %433, %434 : vector<8x32xf32>
    %436 = vector.extract_strided_slice %415 {offsets = [0, 64], sizes = [8, 32], strides = [1, 1]} : vector<8x128xf32> to vector<8x32xf32>
    %437 = math.tanh %436 : vector<8x32xf32>
    %438 = vector.extract_strided_slice %415 {offsets = [0, 96], sizes = [8, 32], strides = [1, 1]} : vector<8x128xf32> to vector<8x32xf32>
    %439 = arith.negf %438 : vector<8x32xf32>
    %440 = math.exp %439 : vector<8x32xf32>
    %cst_82 = arith.constant 1.000000e+00 : f32
    %441 = vector.broadcast %cst_82 : f32 to vector<8x32xf32>
    %442 = arith.addf %441, %440 : vector<8x32xf32>
    %443 = arith.divf %441, %442 : vector<8x32xf32>
    %444 = arith.mulf %435, %397 : vector<8x32xf32>
    %445 = arith.mulf %429, %437 : vector<8x32xf32>
    %446 = arith.addf %444, %445 : vector<8x32xf32>
    %447 = math.tanh %446 : vector<8x32xf32>
    %448 = arith.mulf %443, %447 : vector<8x32xf32>
    %449 = vector.extract_strided_slice %419 {offsets = [0, 0], sizes = [8, 32], strides = [1, 1]} : vector<8x128xf32> to vector<8x32xf32>
    %450 = arith.negf %449 : vector<8x32xf32>
    %451 = math.exp %450 : vector<8x32xf32>
    %cst_83 = arith.constant 1.000000e+00 : f32
    %452 = vector.broadcast %cst_83 : f32 to vector<8x32xf32>
    %453 = arith.addf %452, %451 : vector<8x32xf32>
    %454 = arith.divf %452, %453 : vector<8x32xf32>
    %455 = vector.extract_strided_slice %419 {offsets = [0, 32], sizes = [8, 32], strides = [1, 1]} : vector<8x128xf32> to vector<8x32xf32>
    %456 = arith.negf %455 : vector<8x32xf32>
    %457 = math.exp %456 : vector<8x32xf32>
    %cst_84 = arith.constant 1.000000e+00 : f32
    %458 = vector.broadcast %cst_84 : f32 to vector<8x32xf32>
    %459 = arith.addf %458, %457 : vector<8x32xf32>
    %460 = arith.divf %458, %459 : vector<8x32xf32>
    %461 = vector.extract_strided_slice %419 {offsets = [0, 64], sizes = [8, 32], strides = [1, 1]} : vector<8x128xf32> to vector<8x32xf32>
    %462 = math.tanh %461 : vector<8x32xf32>
    %463 = vector.extract_strided_slice %419 {offsets = [0, 96], sizes = [8, 32], strides = [1, 1]} : vector<8x128xf32> to vector<8x32xf32>
    %464 = arith.negf %463 : vector<8x32xf32>
    %465 = math.exp %464 : vector<8x32xf32>
    %cst_85 = arith.constant 1.000000e+00 : f32
    %466 = vector.broadcast %cst_85 : f32 to vector<8x32xf32>
    %467 = arith.addf %466, %465 : vector<8x32xf32>
    %468 = arith.divf %466, %467 : vector<8x32xf32>
    %469 = arith.mulf %460, %411 : vector<8x32xf32>
    %470 = arith.mulf %454, %462 : vector<8x32xf32>
    %471 = arith.addf %469, %470 : vector<8x32xf32>
    %472 = math.tanh %471 : vector<8x32xf32>
    %473 = arith.mulf %468, %472 : vector<8x32xf32>
    %474 = vector.broadcast %421 : vector<8x1xf32> to vector<8x32xf32>
    %475 = arith.mulf %474, %448 : vector<8x32xf32>
    %c4_86 = arith.constant 4 : index
    %c0_87 = arith.constant 0 : index
    %c0_88 = arith.constant 0 : index
    %476 = vector.load %arg12[%c4_86, %c0_87, %c0_88] : memref<8x8x64xf32, #tpu.memory_space<vmem>>, vector<1x8x32xf32>
    %477 = vector.shape_cast %476 : vector<1x8x32xf32> to vector<8x32xf32>
    %478 = vector.shape_cast %475 : vector<8x32xf32> to vector<1x8x32xf32>
    tpu.vector_store %arg12[%c4_86, %c0_87, %c0_88], %478 {strides = array<i32>} : memref<8x8x64xf32, #tpu.memory_space<vmem>>, vector<1x8x32xf32>,
    %479 = vector.broadcast %423 : vector<8x1xf32> to vector<8x32xf32>
    %480 = arith.mulf %479, %473 : vector<8x32xf32>
    %c3_89 = arith.constant 3 : index
    %c0_90 = arith.constant 0 : index
    %c32_91 = arith.constant 32 : index
    %481 = vector.load %arg12[%c3_89, %c0_90, %c32_91] : memref<8x8x64xf32, #tpu.memory_space<vmem>>, vector<1x8x32xf32>
    %482 = vector.shape_cast %481 : vector<1x8x32xf32> to vector<8x32xf32>
    %483 = vector.shape_cast %480 : vector<8x32xf32> to vector<1x8x32xf32>
    tpu.vector_store %arg12[%c3_89, %c0_90, %c32_91], %483 {strides = array<i32>} : memref<8x8x64xf32, #tpu.memory_space<vmem>>, vector<1x8x32xf32>,
    %484 = vector.broadcast %421 : vector<8x1xf32> to vector<8x32xf32>
    %485 = arith.mulf %484, %448 : vector<8x32xf32>
    %cst_92 = arith.constant 1.000000e+00 : f32
    %486 = vector.broadcast %cst_92 : f32 to vector<8x1xf32>
    %487 = arith.subf %486, %421 : vector<8x1xf32>
    %488 = vector.broadcast %487 : vector<8x1xf32> to vector<8x32xf32>
    %489 = arith.mulf %488, %390 : vector<8x32xf32>
    %490 = arith.addf %485, %489 : vector<8x32xf32>
    %491 = vector.broadcast %421 : vector<8x1xf32> to vector<8x32xf32>
    %492 = arith.mulf %491, %446 : vector<8x32xf32>
    %cst_93 = arith.constant 1.000000e+00 : f32
    %493 = vector.broadcast %cst_93 : f32 to vector<8x1xf32>
    %494 = arith.subf %493, %421 : vector<8x1xf32>
    %495 = vector.broadcast %494 : vector<8x1xf32> to vector<8x32xf32>
    %496 = arith.mulf %495, %397 : vector<8x32xf32>
    %497 = arith.addf %492, %496 : vector<8x32xf32>
    %498 = vector.broadcast %423 : vector<8x1xf32> to vector<8x32xf32>
    %499 = arith.mulf %498, %473 : vector<8x32xf32>
    %cst_94 = arith.constant 1.000000e+00 : f32
    %500 = vector.broadcast %cst_94 : f32 to vector<8x1xf32>
    %501 = arith.subf %500, %423 : vector<8x1xf32>
    %502 = vector.broadcast %501 : vector<8x1xf32> to vector<8x32xf32>
    %503 = arith.mulf %502, %404 : vector<8x32xf32>
    %504 = arith.addf %499, %503 : vector<8x32xf32>
    %505 = vector.broadcast %423 : vector<8x1xf32> to vector<8x32xf32>
    %506 = arith.mulf %505, %471 : vector<8x32xf32>
    %cst_95 = arith.constant 1.000000e+00 : f32
    %507 = vector.broadcast %cst_95 : f32 to vector<8x1xf32>
    %508 = arith.subf %507, %423 : vector<8x1xf32>
    %509 = vector.broadcast %508 : vector<8x1xf32> to vector<8x32xf32>
    %510 = arith.mulf %509, %411 : vector<8x32xf32>
    %511 = arith.addf %506, %510 : vector<8x32xf32>
    %512 = vector.extract_strided_slice %7 {offsets = [5, 0, 0], sizes = [1, 8, 128], strides = [1, 1, 1]} : vector<8x8x256xf32> to vector<1x8x128xf32>
    %513 = vector.shape_cast %512 : vector<1x8x128xf32> to vector<8x128xf32>
    %cst_96 = arith.constant dense<0.000000e+00> : vector<8x128xf32>
    %514 = tpu.matmul %490, %9, %cst_96 {dimension_numbers = #tpu.dot_dimension_numbers<[1], [0], [0], [1], [0, 0, 1, 1], [], []>} : vector<8x32xf32>, vector<32x128xf32>, vector<8x128xf32> -> vector<8x128xf32>
    %515 = arith.addf %513, %514 : vector<8x128xf32>
    %516 = vector.extract_strided_slice %7 {offsets = [2, 0, 128], sizes = [1, 8, 128], strides = [1, 1, 1]} : vector<8x8x256xf32> to vector<1x8x128xf32>
    %517 = vector.shape_cast %516 : vector<1x8x128xf32> to vector<8x128xf32>
    %cst_97 = arith.constant dense<0.000000e+00> : vector<8x128xf32>
    %518 = tpu.matmul %504, %10, %cst_97 {dimension_numbers = #tpu.dot_dimension_numbers<[1], [0], [0], [1], [0, 0, 1, 1], [], []>} : vector<8x32xf32>, vector<32x128xf32>, vector<8x128xf32> -> vector<8x128xf32>
    %519 = arith.addf %517, %518 : vector<8x128xf32>
    %520 = vector.extract_strided_slice %8 {offsets = [5, 0, 0], sizes = [1, 8, 1], strides = [1, 1, 1]} : vector<8x8x1xf32> to vector<1x8x1xf32>
    %521 = vector.shape_cast %520 : vector<1x8x1xf32> to vector<8x1xf32>
    %522 = vector.extract_strided_slice %8 {offsets = [2, 0, 0], sizes = [1, 8, 1], strides = [1, 1, 1]} : vector<8x8x1xf32> to vector<1x8x1xf32>
    %523 = vector.shape_cast %522 : vector<1x8x1xf32> to vector<8x1xf32>
    %524 = vector.extract_strided_slice %515 {offsets = [0, 0], sizes = [8, 32], strides = [1, 1]} : vector<8x128xf32> to vector<8x32xf32>
    %525 = arith.negf %524 : vector<8x32xf32>
    %526 = math.exp %525 : vector<8x32xf32>
    %cst_98 = arith.constant 1.000000e+00 : f32
    %527 = vector.broadcast %cst_98 : f32 to vector<8x32xf32>
    %528 = arith.addf %527, %526 : vector<8x32xf32>
    %529 = arith.divf %527, %528 : vector<8x32xf32>
    %530 = vector.extract_strided_slice %515 {offsets = [0, 32], sizes = [8, 32], strides = [1, 1]} : vector<8x128xf32> to vector<8x32xf32>
    %531 = arith.negf %530 : vector<8x32xf32>
    %532 = math.exp %531 : vector<8x32xf32>
    %cst_99 = arith.constant 1.000000e+00 : f32
    %533 = vector.broadcast %cst_99 : f32 to vector<8x32xf32>
    %534 = arith.addf %533, %532 : vector<8x32xf32>
    %535 = arith.divf %533, %534 : vector<8x32xf32>
    %536 = vector.extract_strided_slice %515 {offsets = [0, 64], sizes = [8, 32], strides = [1, 1]} : vector<8x128xf32> to vector<8x32xf32>
    %537 = math.tanh %536 : vector<8x32xf32>
    %538 = vector.extract_strided_slice %515 {offsets = [0, 96], sizes = [8, 32], strides = [1, 1]} : vector<8x128xf32> to vector<8x32xf32>
    %539 = arith.negf %538 : vector<8x32xf32>
    %540 = math.exp %539 : vector<8x32xf32>
    %cst_100 = arith.constant 1.000000e+00 : f32
    %541 = vector.broadcast %cst_100 : f32 to vector<8x32xf32>
    %542 = arith.addf %541, %540 : vector<8x32xf32>
    %543 = arith.divf %541, %542 : vector<8x32xf32>
    %544 = arith.mulf %535, %497 : vector<8x32xf32>
    %545 = arith.mulf %529, %537 : vector<8x32xf32>
    %546 = arith.addf %544, %545 : vector<8x32xf32>
    %547 = math.tanh %546 : vector<8x32xf32>
    %548 = arith.mulf %543, %547 : vector<8x32xf32>
    %549 = vector.extract_strided_slice %519 {offsets = [0, 0], sizes = [8, 32], strides = [1, 1]} : vector<8x128xf32> to vector<8x32xf32>
    %550 = arith.negf %549 : vector<8x32xf32>
    %551 = math.exp %550 : vector<8x32xf32>
    %cst_101 = arith.constant 1.000000e+00 : f32
    %552 = vector.broadcast %cst_101 : f32 to vector<8x32xf32>
    %553 = arith.addf %552, %551 : vector<8x32xf32>
    %554 = arith.divf %552, %553 : vector<8x32xf32>
    %555 = vector.extract_strided_slice %519 {offsets = [0, 32], sizes = [8, 32], strides = [1, 1]} : vector<8x128xf32> to vector<8x32xf32>
    %556 = arith.negf %555 : vector<8x32xf32>
    %557 = math.exp %556 : vector<8x32xf32>
    %cst_102 = arith.constant 1.000000e+00 : f32
    %558 = vector.broadcast %cst_102 : f32 to vector<8x32xf32>
    %559 = arith.addf %558, %557 : vector<8x32xf32>
    %560 = arith.divf %558, %559 : vector<8x32xf32>
    %561 = vector.extract_strided_slice %519 {offsets = [0, 64], sizes = [8, 32], strides = [1, 1]} : vector<8x128xf32> to vector<8x32xf32>
    %562 = math.tanh %561 : vector<8x32xf32>
    %563 = vector.extract_strided_slice %519 {offsets = [0, 96], sizes = [8, 32], strides = [1, 1]} : vector<8x128xf32> to vector<8x32xf32>
    %564 = arith.negf %563 : vector<8x32xf32>
    %565 = math.exp %564 : vector<8x32xf32>
    %cst_103 = arith.constant 1.000000e+00 : f32
    %566 = vector.broadcast %cst_103 : f32 to vector<8x32xf32>
    %567 = arith.addf %566, %565 : vector<8x32xf32>
    %568 = arith.divf %566, %567 : vector<8x32xf32>
    %569 = arith.mulf %560, %511 : vector<8x32xf32>
    %570 = arith.mulf %554, %562 : vector<8x32xf32>
    %571 = arith.addf %569, %570 : vector<8x32xf32>
    %572 = math.tanh %571 : vector<8x32xf32>
    %573 = arith.mulf %568, %572 : vector<8x32xf32>
    %574 = vector.broadcast %521 : vector<8x1xf32> to vector<8x32xf32>
    %575 = arith.mulf %574, %548 : vector<8x32xf32>
    %c5_104 = arith.constant 5 : index
    %c0_105 = arith.constant 0 : index
    %c0_106 = arith.constant 0 : index
    %576 = vector.load %arg12[%c5_104, %c0_105, %c0_106] : memref<8x8x64xf32, #tpu.memory_space<vmem>>, vector<1x8x32xf32>
    %577 = vector.shape_cast %576 : vector<1x8x32xf32> to vector<8x32xf32>
    %578 = vector.shape_cast %575 : vector<8x32xf32> to vector<1x8x32xf32>
    tpu.vector_store %arg12[%c5_104, %c0_105, %c0_106], %578 {strides = array<i32>} : memref<8x8x64xf32, #tpu.memory_space<vmem>>, vector<1x8x32xf32>,
    %579 = vector.broadcast %523 : vector<8x1xf32> to vector<8x32xf32>
    %580 = arith.mulf %579, %573 : vector<8x32xf32>
    %c2_107 = arith.constant 2 : index
    %c0_108 = arith.constant 0 : index
    %c32_109 = arith.constant 32 : index
    %581 = vector.load %arg12[%c2_107, %c0_108, %c32_109] : memref<8x8x64xf32, #tpu.memory_space<vmem>>, vector<1x8x32xf32>
    %582 = vector.shape_cast %581 : vector<1x8x32xf32> to vector<8x32xf32>
    %583 = vector.shape_cast %580 : vector<8x32xf32> to vector<1x8x32xf32>
    tpu.vector_store %arg12[%c2_107, %c0_108, %c32_109], %583 {strides = array<i32>} : memref<8x8x64xf32, #tpu.memory_space<vmem>>, vector<1x8x32xf32>,
    %584 = vector.broadcast %521 : vector<8x1xf32> to vector<8x32xf32>
    %585 = arith.mulf %584, %548 : vector<8x32xf32>
    %cst_110 = arith.constant 1.000000e+00 : f32
    %586 = vector.broadcast %cst_110 : f32 to vector<8x1xf32>
    %587 = arith.subf %586, %521 : vector<8x1xf32>
    %588 = vector.broadcast %587 : vector<8x1xf32> to vector<8x32xf32>
    %589 = arith.mulf %588, %490 : vector<8x32xf32>
    %590 = arith.addf %585, %589 : vector<8x32xf32>
    %591 = vector.broadcast %521 : vector<8x1xf32> to vector<8x32xf32>
    %592 = arith.mulf %591, %546 : vector<8x32xf32>
    %cst_111 = arith.constant 1.000000e+00 : f32
    %593 = vector.broadcast %cst_111 : f32 to vector<8x1xf32>
    %594 = arith.subf %593, %521 : vector<8x1xf32>
    %595 = vector.broadcast %594 : vector<8x1xf32> to vector<8x32xf32>
    %596 = arith.mulf %595, %497 : vector<8x32xf32>
    %597 = arith.addf %592, %596 : vector<8x32xf32>
    %598 = vector.broadcast %523 : vector<8x1xf32> to vector<8x32xf32>
    %599 = arith.mulf %598, %573 : vector<8x32xf32>
    %cst_112 = arith.constant 1.000000e+00 : f32
    %600 = vector.broadcast %cst_112 : f32 to vector<8x1xf32>
    %601 = arith.subf %600, %523 : vector<8x1xf32>
    %602 = vector.broadcast %601 : vector<8x1xf32> to vector<8x32xf32>
    %603 = arith.mulf %602, %504 : vector<8x32xf32>
    %604 = arith.addf %599, %603 : vector<8x32xf32>
    %605 = vector.broadcast %523 : vector<8x1xf32> to vector<8x32xf32>
    %606 = arith.mulf %605, %571 : vector<8x32xf32>
    %cst_113 = arith.constant 1.000000e+00 : f32
    %607 = vector.broadcast %cst_113 : f32 to vector<8x1xf32>
    %608 = arith.subf %607, %523 : vector<8x1xf32>
    %609 = vector.broadcast %608 : vector<8x1xf32> to vector<8x32xf32>
    %610 = arith.mulf %609, %511 : vector<8x32xf32>
    %611 = arith.addf %606, %610 : vector<8x32xf32>
    %612 = vector.extract_strided_slice %7 {offsets = [6, 0, 0], sizes = [1, 8, 128], strides = [1, 1, 1]} : vector<8x8x256xf32> to vector<1x8x128xf32>
    %613 = vector.shape_cast %612 : vector<1x8x128xf32> to vector<8x128xf32>
    %cst_114 = arith.constant dense<0.000000e+00> : vector<8x128xf32>
    %614 = tpu.matmul %590, %9, %cst_114 {dimension_numbers = #tpu.dot_dimension_numbers<[1], [0], [0], [1], [0, 0, 1, 1], [], []>} : vector<8x32xf32>, vector<32x128xf32>, vector<8x128xf32> -> vector<8x128xf32>
    %615 = arith.addf %613, %614 : vector<8x128xf32>
    %616 = vector.extract_strided_slice %7 {offsets = [1, 0, 128], sizes = [1, 8, 128], strides = [1, 1, 1]} : vector<8x8x256xf32> to vector<1x8x128xf32>
    %617 = vector.shape_cast %616 : vector<1x8x128xf32> to vector<8x128xf32>
    %cst_115 = arith.constant dense<0.000000e+00> : vector<8x128xf32>
    %618 = tpu.matmul %604, %10, %cst_115 {dimension_numbers = #tpu.dot_dimension_numbers<[1], [0], [0], [1], [0, 0, 1, 1], [], []>} : vector<8x32xf32>, vector<32x128xf32>, vector<8x128xf32> -> vector<8x128xf32>
    %619 = arith.addf %617, %618 : vector<8x128xf32>
    %620 = vector.extract_strided_slice %8 {offsets = [6, 0, 0], sizes = [1, 8, 1], strides = [1, 1, 1]} : vector<8x8x1xf32> to vector<1x8x1xf32>
    %621 = vector.shape_cast %620 : vector<1x8x1xf32> to vector<8x1xf32>
    %622 = vector.extract_strided_slice %8 {offsets = [1, 0, 0], sizes = [1, 8, 1], strides = [1, 1, 1]} : vector<8x8x1xf32> to vector<1x8x1xf32>
    %623 = vector.shape_cast %622 : vector<1x8x1xf32> to vector<8x1xf32>
    %624 = vector.extract_strided_slice %615 {offsets = [0, 0], sizes = [8, 32], strides = [1, 1]} : vector<8x128xf32> to vector<8x32xf32>
    %625 = arith.negf %624 : vector<8x32xf32>
    %626 = math.exp %625 : vector<8x32xf32>
    %cst_116 = arith.constant 1.000000e+00 : f32
    %627 = vector.broadcast %cst_116 : f32 to vector<8x32xf32>
    %628 = arith.addf %627, %626 : vector<8x32xf32>
    %629 = arith.divf %627, %628 : vector<8x32xf32>
    %630 = vector.extract_strided_slice %615 {offsets = [0, 32], sizes = [8, 32], strides = [1, 1]} : vector<8x128xf32> to vector<8x32xf32>
    %631 = arith.negf %630 : vector<8x32xf32>
    %632 = math.exp %631 : vector<8x32xf32>
    %cst_117 = arith.constant 1.000000e+00 : f32
    %633 = vector.broadcast %cst_117 : f32 to vector<8x32xf32>
    %634 = arith.addf %633, %632 : vector<8x32xf32>
    %635 = arith.divf %633, %634 : vector<8x32xf32>
    %636 = vector.extract_strided_slice %615 {offsets = [0, 64], sizes = [8, 32], strides = [1, 1]} : vector<8x128xf32> to vector<8x32xf32>
    %637 = math.tanh %636 : vector<8x32xf32>
    %638 = vector.extract_strided_slice %615 {offsets = [0, 96], sizes = [8, 32], strides = [1, 1]} : vector<8x128xf32> to vector<8x32xf32>
    %639 = arith.negf %638 : vector<8x32xf32>
    %640 = math.exp %639 : vector<8x32xf32>
    %cst_118 = arith.constant 1.000000e+00 : f32
    %641 = vector.broadcast %cst_118 : f32 to vector<8x32xf32>
    %642 = arith.addf %641, %640 : vector<8x32xf32>
    %643 = arith.divf %641, %642 : vector<8x32xf32>
    %644 = arith.mulf %635, %597 : vector<8x32xf32>
    %645 = arith.mulf %629, %637 : vector<8x32xf32>
    %646 = arith.addf %644, %645 : vector<8x32xf32>
    %647 = math.tanh %646 : vector<8x32xf32>
    %648 = arith.mulf %643, %647 : vector<8x32xf32>
    %649 = vector.extract_strided_slice %619 {offsets = [0, 0], sizes = [8, 32], strides = [1, 1]} : vector<8x128xf32> to vector<8x32xf32>
    %650 = arith.negf %649 : vector<8x32xf32>
    %651 = math.exp %650 : vector<8x32xf32>
    %cst_119 = arith.constant 1.000000e+00 : f32
    %652 = vector.broadcast %cst_119 : f32 to vector<8x32xf32>
    %653 = arith.addf %652, %651 : vector<8x32xf32>
    %654 = arith.divf %652, %653 : vector<8x32xf32>
    %655 = vector.extract_strided_slice %619 {offsets = [0, 32], sizes = [8, 32], strides = [1, 1]} : vector<8x128xf32> to vector<8x32xf32>
    %656 = arith.negf %655 : vector<8x32xf32>
    %657 = math.exp %656 : vector<8x32xf32>
    %cst_120 = arith.constant 1.000000e+00 : f32
    %658 = vector.broadcast %cst_120 : f32 to vector<8x32xf32>
    %659 = arith.addf %658, %657 : vector<8x32xf32>
    %660 = arith.divf %658, %659 : vector<8x32xf32>
    %661 = vector.extract_strided_slice %619 {offsets = [0, 64], sizes = [8, 32], strides = [1, 1]} : vector<8x128xf32> to vector<8x32xf32>
    %662 = math.tanh %661 : vector<8x32xf32>
    %663 = vector.extract_strided_slice %619 {offsets = [0, 96], sizes = [8, 32], strides = [1, 1]} : vector<8x128xf32> to vector<8x32xf32>
    %664 = arith.negf %663 : vector<8x32xf32>
    %665 = math.exp %664 : vector<8x32xf32>
    %cst_121 = arith.constant 1.000000e+00 : f32
    %666 = vector.broadcast %cst_121 : f32 to vector<8x32xf32>
    %667 = arith.addf %666, %665 : vector<8x32xf32>
    %668 = arith.divf %666, %667 : vector<8x32xf32>
    %669 = arith.mulf %660, %611 : vector<8x32xf32>
    %670 = arith.mulf %654, %662 : vector<8x32xf32>
    %671 = arith.addf %669, %670 : vector<8x32xf32>
    %672 = math.tanh %671 : vector<8x32xf32>
    %673 = arith.mulf %668, %672 : vector<8x32xf32>
    %674 = vector.broadcast %621 : vector<8x1xf32> to vector<8x32xf32>
    %675 = arith.mulf %674, %648 : vector<8x32xf32>
    %c6_122 = arith.constant 6 : index
    %c0_123 = arith.constant 0 : index
    %c0_124 = arith.constant 0 : index
    %676 = vector.load %arg12[%c6_122, %c0_123, %c0_124] : memref<8x8x64xf32, #tpu.memory_space<vmem>>, vector<1x8x32xf32>
    %677 = vector.shape_cast %676 : vector<1x8x32xf32> to vector<8x32xf32>
    %678 = vector.shape_cast %675 : vector<8x32xf32> to vector<1x8x32xf32>
    tpu.vector_store %arg12[%c6_122, %c0_123, %c0_124], %678 {strides = array<i32>} : memref<8x8x64xf32, #tpu.memory_space<vmem>>, vector<1x8x32xf32>,
    %679 = vector.broadcast %623 : vector<8x1xf32> to vector<8x32xf32>
    %680 = arith.mulf %679, %673 : vector<8x32xf32>
    %c1_125 = arith.constant 1 : index
    %c0_126 = arith.constant 0 : index
    %c32_127 = arith.constant 32 : index
    %681 = vector.load %arg12[%c1_125, %c0_126, %c32_127] : memref<8x8x64xf32, #tpu.memory_space<vmem>>, vector<1x8x32xf32>
    %682 = vector.shape_cast %681 : vector<1x8x32xf32> to vector<8x32xf32>
    %683 = vector.shape_cast %680 : vector<8x32xf32> to vector<1x8x32xf32>
    tpu.vector_store %arg12[%c1_125, %c0_126, %c32_127], %683 {strides = array<i32>} : memref<8x8x64xf32, #tpu.memory_space<vmem>>, vector<1x8x32xf32>,
    %684 = vector.broadcast %621 : vector<8x1xf32> to vector<8x32xf32>
    %685 = arith.mulf %684, %648 : vector<8x32xf32>
    %cst_128 = arith.constant 1.000000e+00 : f32
    %686 = vector.broadcast %cst_128 : f32 to vector<8x1xf32>
    %687 = arith.subf %686, %621 : vector<8x1xf32>
    %688 = vector.broadcast %687 : vector<8x1xf32> to vector<8x32xf32>
    %689 = arith.mulf %688, %590 : vector<8x32xf32>
    %690 = arith.addf %685, %689 : vector<8x32xf32>
    %691 = vector.broadcast %621 : vector<8x1xf32> to vector<8x32xf32>
    %692 = arith.mulf %691, %646 : vector<8x32xf32>
    %cst_129 = arith.constant 1.000000e+00 : f32
    %693 = vector.broadcast %cst_129 : f32 to vector<8x1xf32>
    %694 = arith.subf %693, %621 : vector<8x1xf32>
    %695 = vector.broadcast %694 : vector<8x1xf32> to vector<8x32xf32>
    %696 = arith.mulf %695, %597 : vector<8x32xf32>
    %697 = arith.addf %692, %696 : vector<8x32xf32>
    %698 = vector.broadcast %623 : vector<8x1xf32> to vector<8x32xf32>
    %699 = arith.mulf %698, %673 : vector<8x32xf32>
    %cst_130 = arith.constant 1.000000e+00 : f32
    %700 = vector.broadcast %cst_130 : f32 to vector<8x1xf32>
    %701 = arith.subf %700, %623 : vector<8x1xf32>
    %702 = vector.broadcast %701 : vector<8x1xf32> to vector<8x32xf32>
    %703 = arith.mulf %702, %604 : vector<8x32xf32>
    %704 = arith.addf %699, %703 : vector<8x32xf32>
    %705 = vector.broadcast %623 : vector<8x1xf32> to vector<8x32xf32>
    %706 = arith.mulf %705, %671 : vector<8x32xf32>
    %cst_131 = arith.constant 1.000000e+00 : f32
    %707 = vector.broadcast %cst_131 : f32 to vector<8x1xf32>
    %708 = arith.subf %707, %623 : vector<8x1xf32>
    %709 = vector.broadcast %708 : vector<8x1xf32> to vector<8x32xf32>
    %710 = arith.mulf %709, %611 : vector<8x32xf32>
    %711 = arith.addf %706, %710 : vector<8x32xf32>
    %712 = vector.extract_strided_slice %7 {offsets = [7, 0, 0], sizes = [1, 8, 128], strides = [1, 1, 1]} : vector<8x8x256xf32> to vector<1x8x128xf32>
    %713 = vector.shape_cast %712 : vector<1x8x128xf32> to vector<8x128xf32>
    %cst_132 = arith.constant dense<0.000000e+00> : vector<8x128xf32>
    %714 = tpu.matmul %690, %9, %cst_132 {dimension_numbers = #tpu.dot_dimension_numbers<[1], [0], [0], [1], [0, 0, 1, 1], [], []>} : vector<8x32xf32>, vector<32x128xf32>, vector<8x128xf32> -> vector<8x128xf32>
    %715 = arith.addf %713, %714 : vector<8x128xf32>
    %716 = vector.extract_strided_slice %7 {offsets = [0, 0, 128], sizes = [1, 8, 128], strides = [1, 1, 1]} : vector<8x8x256xf32> to vector<1x8x128xf32>
    %717 = vector.shape_cast %716 : vector<1x8x128xf32> to vector<8x128xf32>
    %cst_133 = arith.constant dense<0.000000e+00> : vector<8x128xf32>
    %718 = tpu.matmul %704, %10, %cst_133 {dimension_numbers = #tpu.dot_dimension_numbers<[1], [0], [0], [1], [0, 0, 1, 1], [], []>} : vector<8x32xf32>, vector<32x128xf32>, vector<8x128xf32> -> vector<8x128xf32>
    %719 = arith.addf %717, %718 : vector<8x128xf32>
    %720 = vector.extract_strided_slice %8 {offsets = [7, 0, 0], sizes = [1, 8, 1], strides = [1, 1, 1]} : vector<8x8x1xf32> to vector<1x8x1xf32>
    %721 = vector.shape_cast %720 : vector<1x8x1xf32> to vector<8x1xf32>
    %722 = vector.extract_strided_slice %8 {offsets = [0, 0, 0], sizes = [1, 8, 1], strides = [1, 1, 1]} : vector<8x8x1xf32> to vector<1x8x1xf32>
    %723 = vector.shape_cast %722 : vector<1x8x1xf32> to vector<8x1xf32>
    %724 = vector.extract_strided_slice %715 {offsets = [0, 0], sizes = [8, 32], strides = [1, 1]} : vector<8x128xf32> to vector<8x32xf32>
    %725 = arith.negf %724 : vector<8x32xf32>
    %726 = math.exp %725 : vector<8x32xf32>
    %cst_134 = arith.constant 1.000000e+00 : f32
    %727 = vector.broadcast %cst_134 : f32 to vector<8x32xf32>
    %728 = arith.addf %727, %726 : vector<8x32xf32>
    %729 = arith.divf %727, %728 : vector<8x32xf32>
    %730 = vector.extract_strided_slice %715 {offsets = [0, 32], sizes = [8, 32], strides = [1, 1]} : vector<8x128xf32> to vector<8x32xf32>
    %731 = arith.negf %730 : vector<8x32xf32>
    %732 = math.exp %731 : vector<8x32xf32>
    %cst_135 = arith.constant 1.000000e+00 : f32
    %733 = vector.broadcast %cst_135 : f32 to vector<8x32xf32>
    %734 = arith.addf %733, %732 : vector<8x32xf32>
    %735 = arith.divf %733, %734 : vector<8x32xf32>
    %736 = vector.extract_strided_slice %715 {offsets = [0, 64], sizes = [8, 32], strides = [1, 1]} : vector<8x128xf32> to vector<8x32xf32>
    %737 = math.tanh %736 : vector<8x32xf32>
    %738 = vector.extract_strided_slice %715 {offsets = [0, 96], sizes = [8, 32], strides = [1, 1]} : vector<8x128xf32> to vector<8x32xf32>
    %739 = arith.negf %738 : vector<8x32xf32>
    %740 = math.exp %739 : vector<8x32xf32>
    %cst_136 = arith.constant 1.000000e+00 : f32
    %741 = vector.broadcast %cst_136 : f32 to vector<8x32xf32>
    %742 = arith.addf %741, %740 : vector<8x32xf32>
    %743 = arith.divf %741, %742 : vector<8x32xf32>
    %744 = arith.mulf %735, %697 : vector<8x32xf32>
    %745 = arith.mulf %729, %737 : vector<8x32xf32>
    %746 = arith.addf %744, %745 : vector<8x32xf32>
    %747 = math.tanh %746 : vector<8x32xf32>
    %748 = arith.mulf %743, %747 : vector<8x32xf32>
    %749 = vector.extract_strided_slice %719 {offsets = [0, 0], sizes = [8, 32], strides = [1, 1]} : vector<8x128xf32> to vector<8x32xf32>
    %750 = arith.negf %749 : vector<8x32xf32>
    %751 = math.exp %750 : vector<8x32xf32>
    %cst_137 = arith.constant 1.000000e+00 : f32
    %752 = vector.broadcast %cst_137 : f32 to vector<8x32xf32>
    %753 = arith.addf %752, %751 : vector<8x32xf32>
    %754 = arith.divf %752, %753 : vector<8x32xf32>
    %755 = vector.extract_strided_slice %719 {offsets = [0, 32], sizes = [8, 32], strides = [1, 1]} : vector<8x128xf32> to vector<8x32xf32>
    %756 = arith.negf %755 : vector<8x32xf32>
    %757 = math.exp %756 : vector<8x32xf32>
    %cst_138 = arith.constant 1.000000e+00 : f32
    %758 = vector.broadcast %cst_138 : f32 to vector<8x32xf32>
    %759 = arith.addf %758, %757 : vector<8x32xf32>
    %760 = arith.divf %758, %759 : vector<8x32xf32>
    %761 = vector.extract_strided_slice %719 {offsets = [0, 64], sizes = [8, 32], strides = [1, 1]} : vector<8x128xf32> to vector<8x32xf32>
    %762 = math.tanh %761 : vector<8x32xf32>
    %763 = vector.extract_strided_slice %719 {offsets = [0, 96], sizes = [8, 32], strides = [1, 1]} : vector<8x128xf32> to vector<8x32xf32>
    %764 = arith.negf %763 : vector<8x32xf32>
    %765 = math.exp %764 : vector<8x32xf32>
    %cst_139 = arith.constant 1.000000e+00 : f32
    %766 = vector.broadcast %cst_139 : f32 to vector<8x32xf32>
    %767 = arith.addf %766, %765 : vector<8x32xf32>
    %768 = arith.divf %766, %767 : vector<8x32xf32>
    %769 = arith.mulf %760, %711 : vector<8x32xf32>
    %770 = arith.mulf %754, %762 : vector<8x32xf32>
    %771 = arith.addf %769, %770 : vector<8x32xf32>
    %772 = math.tanh %771 : vector<8x32xf32>
    %773 = arith.mulf %768, %772 : vector<8x32xf32>
    %774 = vector.broadcast %721 : vector<8x1xf32> to vector<8x32xf32>
    %775 = arith.mulf %774, %748 : vector<8x32xf32>
    %c7_140 = arith.constant 7 : index
    %c0_141 = arith.constant 0 : index
    %c0_142 = arith.constant 0 : index
    %776 = vector.load %arg12[%c7_140, %c0_141, %c0_142] : memref<8x8x64xf32, #tpu.memory_space<vmem>>, vector<1x8x32xf32>
    %777 = vector.shape_cast %776 : vector<1x8x32xf32> to vector<8x32xf32>
    %778 = vector.shape_cast %775 : vector<8x32xf32> to vector<1x8x32xf32>
    tpu.vector_store %arg12[%c7_140, %c0_141, %c0_142], %778 {strides = array<i32>} : memref<8x8x64xf32, #tpu.memory_space<vmem>>, vector<1x8x32xf32>,
    %779 = vector.broadcast %723 : vector<8x1xf32> to vector<8x32xf32>
    %780 = arith.mulf %779, %773 : vector<8x32xf32>
    %c0_143 = arith.constant 0 : index
    %c0_144 = arith.constant 0 : index
    %c32_145 = arith.constant 32 : index
    %781 = vector.load %arg12[%c0_143, %c0_144, %c32_145] : memref<8x8x64xf32, #tpu.memory_space<vmem>>, vector<1x8x32xf32>
    %782 = vector.shape_cast %781 : vector<1x8x32xf32> to vector<8x32xf32>
    %783 = vector.shape_cast %780 : vector<8x32xf32> to vector<1x8x32xf32>
    tpu.vector_store %arg12[%c0_143, %c0_144, %c32_145], %783 {strides = array<i32>} : memref<8x8x64xf32, #tpu.memory_space<vmem>>, vector<1x8x32xf32>,
    %c0_146 = arith.constant 0 : index
    %c0_147 = arith.constant 0 : index
    %c0_148 = arith.constant 0 : index
    %784 = vector.load %arg12[%c0_146, %c0_147, %c0_148] : memref<8x8x64xf32, #tpu.memory_space<vmem>>, vector<8x8x64xf32>
    %cst_149 = arith.constant dense<0.000000e+00> : vector<8x8xf32>
    %785 = vector.multi_reduction <add>, %784, %cst_149 [2] : vector<8x8x64xf32> to vector<8x8xf32>
    %786 = vector.shape_cast %785 : vector<8x8xf32> to vector<8x8x1xf32>
    %cst_150 = arith.constant 6.400000e+01 : f32
    %787 = vector.broadcast %cst_150 : f32 to vector<8x8x1xf32>
    %788 = arith.divf %786, %787 : vector<8x8x1xf32>
    %789 = vector.broadcast %788 : vector<8x8x1xf32> to vector<8x8x64xf32>
    %790 = arith.subf %784, %789 : vector<8x8x64xf32>
    %791 = arith.mulf %790, %790 : vector<8x8x64xf32>
    %cst_151 = arith.constant dense<0.000000e+00> : vector<8x8xf32>
    %792 = vector.multi_reduction <add>, %791, %cst_151 [2] : vector<8x8x64xf32> to vector<8x8xf32>
    %793 = vector.shape_cast %792 : vector<8x8xf32> to vector<8x8x1xf32>
    %cst_152 = arith.constant 6.400000e+01 : f32
    %794 = vector.broadcast %cst_152 : f32 to vector<8x8x1xf32>
    %795 = arith.divf %793, %794 : vector<8x8x1xf32>
    %796 = vector.broadcast %788 : vector<8x8x1xf32> to vector<8x8x64xf32>
    %797 = arith.subf %784, %796 : vector<8x8x64xf32>
    %cst_153 = arith.constant 9.99999974E-6 : f32
    %798 = vector.broadcast %cst_153 : f32 to vector<8x8x1xf32>
    %799 = arith.addf %795, %798 : vector<8x8x1xf32>
    %800 = math.rsqrt %799 : vector<8x8x1xf32>
    %801 = vector.broadcast %800 : vector<8x8x1xf32> to vector<8x8x64xf32>
    %802 = arith.mulf %797, %801 : vector<8x8x64xf32>
    %c0_154 = arith.constant 0 : index
    %c0_155 = arith.constant 0 : index
    %803 = vector.load %arg7[%c0_154, %c0_155] : memref<1x64xf32, #tpu.memory_space<vmem>>, vector<1x64xf32>
    %804 = vector.shape_cast %803 : vector<1x64xf32> to vector<1x1x64xf32>
    %805 = vector.broadcast %804 : vector<1x1x64xf32> to vector<8x8x64xf32>
    %806 = arith.mulf %802, %805 : vector<8x8x64xf32>
    %c0_156 = arith.constant 0 : index
    %c0_157 = arith.constant 0 : index
    %807 = vector.load %arg8[%c0_156, %c0_157] : memref<1x64xf32, #tpu.memory_space<vmem>>, vector<1x64xf32>
    %808 = vector.shape_cast %807 : vector<1x64xf32> to vector<1x1x64xf32>
    %809 = vector.broadcast %808 : vector<1x1x64xf32> to vector<8x8x64xf32>
    %810 = arith.addf %806, %809 : vector<8x8x64xf32>
    %811 = vector.broadcast %8 : vector<8x8x1xf32> to vector<8x8x64xf32>
    %812 = arith.mulf %810, %811 : vector<8x8x64xf32>
    %cst_158 = arith.constant dense<0.000000e+00> : vector<8x64xf32>
    %813 = vector.multi_reduction <add>, %812, %cst_158 [0] : vector<8x8x64xf32> to vector<8x64xf32>
    %cst_159 = arith.constant 1.250000e-01 : f32
    %814 = vector.broadcast %cst_159 : f32 to vector<8x64xf32>
    %815 = arith.mulf %813, %814 : vector<8x64xf32>
    %c0_160 = arith.constant 0 : index
    %c0_161 = arith.constant 0 : index
    %816 = vector.load %arg9[%c0_160, %c0_161] : memref<64x8xf32, #tpu.memory_space<vmem>>, vector<64x8xf32>
    %cst_162 = arith.constant dense<0.000000e+00> : vector<8x8xf32>
    %817 = tpu.matmul %815, %816, %cst_162 {dimension_numbers = #tpu.dot_dimension_numbers<[1], [0], [0], [1], [0, 0, 1, 1], [], []>} : vector<8x64xf32>, vector<64x8xf32>, vector<8x8xf32> -> vector<8x8xf32>
    %c0_163 = arith.constant 0 : index
    %c0_164 = arith.constant 0 : index
    %818 = vector.load %arg10[%c0_163, %c0_164] : memref<1x8xf32, #tpu.memory_space<vmem>>, vector<1x8xf32>
    %819 = vector.broadcast %818 : vector<1x8xf32> to vector<8x8xf32>
    %820 = arith.addf %817, %819 : vector<8x8xf32>
    %c0_165 = arith.constant 0 : index
    %c0_166 = arith.constant 0 : index
    %821 = vector.load %arg11[%c0_165, %c0_166] : memref<8x8xf32, #tpu.memory_space<vmem>>, vector<8x8xf32>
    tpu.vector_store %arg11[%c0_165, %c0_166], %820 {strides = array<i32>} : memref<8x8xf32, #tpu.memory_space<vmem>>, vector<8x8xf32>,
    return
  }
  func.func @transform_0(%arg0: i32) -> (i32, i32, i32) {
    %c0_i32 = arith.constant 0 : i32
    %c0_i32_0 = arith.constant 0 : i32
    %c0_i32_1 = arith.constant 0 : i32
    return %c0_i32, %arg0, %c0_i32_0 : i32, i32, i32
  }
  func.func @transform_1(%arg0: i32) -> (i32, i32, i32) {
    %c0_i32 = arith.constant 0 : i32
    %c0_i32_0 = arith.constant 0 : i32
    %c0_i32_1 = arith.constant 0 : i32
    return %c0_i32, %arg0, %c0_i32_0 : i32, i32, i32
  }
  func.func @transform_2(%arg0: i32) -> (i32, i32) {
    %c0_i32 = arith.constant 0 : i32
    %c0_i32_0 = arith.constant 0 : i32
    %c0_i32_1 = arith.constant 0 : i32
    return %c0_i32, %c0_i32_0 : i32, i32
  }
  func.func @transform_3(%arg0: i32) -> (i32, i32) {
    %c0_i32 = arith.constant 0 : i32
    %c0_i32_0 = arith.constant 0 : i32
    %c0_i32_1 = arith.constant 0 : i32
    return %c0_i32, %c0_i32_0 : i32, i32
  }
  func.func @transform_4(%arg0: i32) -> (i32, i32) {
    %c0_i32 = arith.constant 0 : i32
    %c0_i32_0 = arith.constant 0 : i32
    %c0_i32_1 = arith.constant 0 : i32
    return %c0_i32, %c0_i32_0 : i32, i32
  }
  func.func @transform_5(%arg0: i32) -> (i32, i32) {
    %c0_i32 = arith.constant 0 : i32
    %c0_i32_0 = arith.constant 0 : i32
    %c0_i32_1 = arith.constant 0 : i32
    return %c0_i32, %c0_i32_0 : i32, i32
  }
  func.func @transform_6(%arg0: i32) -> (i32, i32) {
    %c0_i32 = arith.constant 0 : i32
    %c0_i32_0 = arith.constant 0 : i32
    %c0_i32_1 = arith.constant 0 : i32
    return %c0_i32, %c0_i32_0 : i32, i32
  }
  func.func @transform_7(%arg0: i32) -> (i32, i32) {
    %c0_i32 = arith.constant 0 : i32
    %c0_i32_0 = arith.constant 0 : i32
    %c0_i32_1 = arith.constant 0 : i32
    return %c0_i32, %c0_i32_0 : i32, i32
  }
  func.func @transform_8(%arg0: i32) -> (i32, i32) {
    %c0_i32 = arith.constant 0 : i32
    %c0_i32_0 = arith.constant 0 : i32
    %c0_i32_1 = arith.constant 0 : i32
    return %c0_i32, %c0_i32_0 : i32, i32
  }
  func.func @transform_9(%arg0: i32) -> (i32, i32) {
    %c0_i32 = arith.constant 0 : i32
    %c0_i32_0 = arith.constant 0 : i32
    %c0_i32_1 = arith.constant 0 : i32
    return %c0_i32, %c0_i32_0 : i32, i32
  }
  func.func @transform_10(%arg0: i32) -> (i32, i32) {
    %c0_i32 = arith.constant 0 : i32
    %c0_i32_0 = arith.constant 0 : i32
    return %arg0, %c0_i32 : i32, i32
  }
}

</mosaic_0001>

<bundles_post_ra>
// kernel: text_bilstm_forward.1
= control target key start
LH: loop header
LB: loop body
LE: loop exit
PB: predicated region body
PF: predicated region fallthrough
CT: control target
= control target key end

     0   :  { %v2930_v3 = vmov 0.0   ;;  %vm63_vm0 = vcmask 261120   ;;  %v2931_v18 = vmov 0.0|0.0   ;;  %vm2932_vm1 = vmmov 0   ;;  %s2935_s14 = smov 32   ;;  %s3770_s2 = inlined_call_operand.vmem [shape: f32[32,256], index: 2, kind: input, shape index: {}]   ;;  %s3771_s3 = inlined_call_operand.vmem [shape: f32[32,128], index: 3, kind: input, shape index: {}]   ;;  %s3772_s0 = inlined_call_operand.vmem [shape: f32[8,8,32], index: 0, kind: input, shape index: {}]   ;;  %s3773_s4 = inlined_call_operand.vmem [shape: f32[32,128], index: 4, kind: input, shape index: {}]   ;;  %s3774_s5 = inlined_call_operand.vmem [shape: f32[1,256], index: 5, kind: input, shape index: {}]   ;;  %s3775_s1 = inlined_call_operand.vmem [shape: f32[8,8,1], index: 1, kind: input, shape index: {}]   ;;  %s3776_s8 = inlined_call_operand.vmem [shape: f32[64,8], index: 8, kind: input, shape index: {}]   ;;  %s3777_s6 = inlined_call_operand.vmem [shape: f32[1,64], index: 6, kind: input, shape index: {}]   ;;  %s3778_s7 = inlined_call_operand.vmem [shape: f32[1,64], index: 7, kind: input, shape index: {}]   ;;  %s3779_s9 = inlined_call_operand.vmem [shape: f32[1,8], index: 9, kind: input, shape index: {}]   ;;  %s3780_s10 = inlined_call_operand.vmem [shape: f32[8,8], index: 10, kind: output, shape index: {}]  }
   0x1   :  { %v44_v0 = vld [vmem:[%s3770_s2 + $0x8] sm:$0xff]  ;;  %v46_v1 = vld [vmem:[%s3770_s2 + $0x18] sm:$0xff]  ;;  %v43_v2 = vld [vmem:[%s3770_s2] sm:$0xff]  ;;  %188 = vmatprep.mubr.f32.mxu1 %v2930_v3  ;;  %152 = vmatprep.mubr.f32.mxu0 %v2930_v3  ;;  %v2933_v29 = vmov 0   ;;  %v53_v30 = vlaneseq  ;;  %vm432_vm2 = vcmask 523520   ;;  %vm2078_vm3 = vcmask 523264  }
   0x2   :  { %v2658_v4 = vpack.c.bf16 %v46_v1, %v44_v0  ;;  %v45_v5 = vld [vmem:[%s3770_s2 + $0x10] sm:$0xff]  ;;  %v48_v6 = vld [vmem:[%s3770_s2 + $0x28] sm:$0xff]  ;;  %v50_v7 = vld [vmem:[%s3770_s2 + $0x38] sm:$0xff]  ;;  %2784 = vset.pattern.permute.xlu0 %v2933_v29  ;;  %2785 = vset.pattern.permute.xlu1 %v2933_v29  ;;  %vm2326_vm4 = vcmask 64512  }
   0x3   :  { %v2660_v8 = vpack.c.bf16 %v45_v5, %v43_v2  ;;  %v2662_v9 = vpack.c.bf16 %v50_v7, %v48_v6  ;;  %v47_v10 = vld [vmem:[%s3770_s2 + $0x20] sm:$0xff]  ;;  %v49_v11 = vld [vmem:[%s3770_s2 + $0x30] sm:$0xff]  ;;  %v210_v14 = vld [vmem:[%s3771_s3 + $0x8] sm:$0xff]  ;;  %v54_v31 = vshrl.u32 %v53_v30, 7 }
   0x4   :  { %2774 = vmatprep.subr.bf16.mxu1 %v2658_v4  ;;  %2659 = vmatprep.subr.bf16.mxu0 %v2658_v4  ;;  %v2664_v12 = vpack.c.bf16 %v49_v11, %v47_v10  ;;  %v209_v13 = vld [vmem:[%s3771_s3] sm:$0xff]  ;;  %v41_v15 = vld [vmem:[%s3772_s0 + $0x30] sm:$0xff]  ;;  %v212_v20 = vld [vmem:[%s3771_s3 + $0x18] sm:$0xff] }
   0x5   :  { %2776 = vmatpush1.bf16.msra.mxu1 %v2660_v8  ;;  %2661 = vmatpush1.bf16.msra.mxu0 %v2660_v8  ;;  %v3026_v16 = vpack.c.bf16 %v210_v14, %v209_v13  ;;  %v35_v17 = vld [vmem:[%s3772_s0] sm:$0xff]  ;;  %v211_v19 = vld [vmem:[%s3771_s3 + $0x10] sm:$0xff]  ;;  %v42_v21 = vld [vmem:[%s3772_s0 + $0x38] sm:$0xff]  ;;  %v55_v32 = vsub.s32 0, %v54_v31  ;;  %v59_v43 = vsub.s32 1, %v54_v31 }
   0x6   :  { %2775 = vmatprep.subr.bf16.mxu1 %v2662_v9  ;;  %2663 = vmatprep.subr.bf16.mxu0 %v2662_v9  ;;  %v3046_v22 = vpack.c.bf16 %v212_v20, %v211_v19  ;;  %v213_v23 = vld [vmem:[%s3773_s4] sm:$0xff]  ;;  %v214_v24 = vld [vmem:[%s3773_s4 + $0x8] sm:$0xff]  ;;  %v215_v26 = vld [vmem:[%s3773_s4 + $0x10] sm:$0xff] }
   0x7   :  { %v3062_v25 = vpack.c.bf16 %v214_v24, %v213_v23  ;;  %v216_v27 = vld [vmem:[%s3773_s4 + $0x18] sm:$0xff]  ;;  %v51_v33 = vld [vmem:[%s3774_s5] sm:$0x3]  ;;  %s2934_s5 = smov 64   ;;  %v36_v14 = vld [vmem:[%s3772_s0 + $0x8] sm:$0xff] }
   0x8   :  { %v3075_v28 = vpack.c.bf16 %v216_v27, %v215_v26  ;;  %v3098_v38 = vrot.slane %v51_v33, %v55_v32  ;;  %v3103_v46 = vrot.slane %v51_v33, %v59_v43  ;;  %v201_v53 = vld [vmem:[%s3775_s1] sm:$0xff]  ;;  %v208_v54 = vld [vmem:[%s3775_s1 + $0x38] sm:$0xff] }
   0x9   :  { %2777 = vmatpush1.bf16.msra.mxu1 %v2664_v12  ;;  %2665 = vmatpush1.bf16.msra.mxu0 %v2664_v12  ;;  %v434_v4 = vsub.f32 1.0, %v201_v53  ;;  %v444_v12 = vsub.f32 1.0, %v208_v54 }
   0xa   :  { %2666 = vmatprep.subr.bf16.mxu1 %v2931_v18  ;;  %2690 = vmatprep.subr.bf16.mxu0 %v2931_v18 }
   0xc   :  { %2338 = vmatmul.mubr.msk.f32.vlgmr.msra.gmra.mrb[0].mxu1 %vm63_vm0, %v41_v15  ;;  %2332 = vmatmul.mubr.msk.f32.vlgmr.msra.gmra.mrb[0].mxu0 %vm63_vm0, %v35_v17 }
   0xd   :  { %2668 = vmatpush3.bf16.msra.mxu1 %v3026_v16  ;;  %194 = vmatprep.mubr.f32.mxu1 %v2930_v3 }
   0xe   :  { %2669 = vmatprep.subr.bf16.mxu1 %v2931_v18  ;;  %158 = vmatprep.mubr.f32.mxu0 %v2930_v3 }
   0xf   :  { %2692 = vmatpush3.bf16.msra.mxu0 %v3026_v16 }
  0x10   :  { %2339 = vmatmul.mubr.msk.f32.gmra.mrb[2].mxu1 %vm63_vm0, %v42_v21  ;;  %2693 = vmatprep.subr.bf16.mxu0 %v2931_v18 }
  0x11   :  { %2671 = vmatpush3.bf16.msra.mxu1 %v3046_v22  ;;  %2471 = vmatprep.mubr.msk.f32.mxu1 %vm2932_vm1, %v2930_v3 }
  0x12   :  { %2672 = vmatprep.subr.bf16.mxu1 %v2931_v18  ;;  %2333 = vmatmul.mubr.msk.f32.gmra.mrb[2].mxu0 %vm63_vm0, %v36_v14 }
  0x13   :  { %2695 = vmatpush3.bf16.msra.mxu0 %v3046_v22  ;;  %164 = vmatprep.mubr.f32.mxu0 %v2930_v3 }
  0x14   :  { %2472 = vmatmul.mubr.f32.vlgmr.msra.gmra.mrb[4].mxu1 %v2930_v3  ;;  %2702 = vmatprep.subr.bf16.mxu0 %v2931_v18 }
  0x15   :  { %2674 = vmatpush3.bf16.msra.mxu1 %v3062_v25  ;;  %2482 = vmatprep.mubr.msk.f32.mxu1 %vm2932_vm1, %v2930_v3 }
  0x16   :  { %2675 = vmatprep.subr.bf16.mxu1 %v2931_v18 }
  0x19   :  { %2677 = vmatpush3.bf16.msra.mxu1 %v3075_v28 }
  0x1a   :  { %2678 = vmatprep.subr.bf16.mxu1 %v2931_v18 }
  0x1c   :  { %2483 = vmatmul.mubr.f32.vlgmr.msra.gmra.mrb[6].mxu1 %v2930_v3 }
  0x1d   :  { %2680 = vmatpush3.bf16.msra.mxu1 %v3026_v16  ;;  %2493 = vmatprep.mubr.msk.f32.mxu1 %vm2932_vm1, %v2930_v3 }
  0x1e   :  { %2681 = vmatprep.subr.bf16.mxu1 %v2931_v18 }
  0x21   :  { %2683 = vmatpush3.bf16.msra.mxu1 %v3046_v22 }
  0x22   :  { %2684 = vmatprep.subr.bf16.mxu1 %v2931_v18 }
  0xdf   :  { %v3092_v34 = vpop.f32.mrb[0].mxu1  ;;  %v154_v35 = vpop.f32.mrb[0].mxu0 }
  0xe0   :  { %v3094_v36 = vpop.f32.mrb[1].mxu1  ;;  %v3096_v37 = vpop.f32.mrb[1].mxu0  ;;  %v155_v41 = vadd.f32 %v154_v35, %v3098_v38 }
  0xe3   :  { %v3100_v39 = vpop.f32.mrb[2].mxu1 }
  0xe4   :  { %v198_v40 = vpop.f32.mrb[3].mxu1 }
  0xe5   :  { %v199_v47 = vadd.f32 %v198_v40, %v3103_v46 }
  0xe7   :  { %v286_v42 = vpop.f32.mrb[4].mxu1 }
  0xe8   :  { %v290_v44 = vadd.f32 %v286_v42, %v155_v41  ;;  %v2473_v45 = vpop.f32.mrb[5].mxu1  ;;  %v160_v41 = vpop.f32.mrb[2].mxu0 }
  0xe9   :  { %v161_v45 = vadd.f32 %v160_v41, %v3098_v38 }
  0xea   :  { %2786 = vtanh.f32 %v290_v44  ;;  %v2340_v55 = vmul.f32 -1.442695, %v290_v44  ;;  %v3166_v44 = vpop.f32.mrb[3].mxu0 }
  0xef   :  { %v357_v48 = vpop.f32.mrb[6].mxu1 }
  0xf0   :  { %v361_v49 = vadd.f32 %v357_v48, %v199_v47  ;;  %v2484_v50 = vpop.f32.mrb[7].mxu1 }
  0xf2   :  { %2788 = vtanh.f32 %v361_v49  ;;  %v2341_v56 = vmul.f32 -1.442695, %v361_v49 }
  0xf3   :  { %2790 = vpow2.f32 %v2340_v55 }
  0xf4   :  { %v2787_v51 = vpop.eup %2786  ;;  %2792 = vpow2.f32 %v2341_v56 }
  0xf5   :  { %371 = vrot.lane.b32.xlu0 %v2787_v51, %s2934_s5  ;;  %v193_v51 = vadd.f32 %v3094_v36, %v3103_v46  ;;  %v207_v36 = vld [vmem:[%s3775_s1 + $0x30] sm:$0xff] }
  0xfc   :  { %v2789_v52 = vpop.eup %2788 }
  0xfd   :  { %395 = vrot.lane.b32.xlu0 %v2789_v52, %s2934_s5  ;;  %v2791_v57 = vpop.eup %2790 }
  0xfe   :  { %v365_v58 = vadd.f32 1.0, %v2791_v57  ;;  %v2793_v59 = vpop.eup %2792 }
  0xff   :  { %v389_v60 = vadd.f32 1.0, %v2793_v59 }
 0x100   :  { %2794 = vrcp.f32 %v365_v58 }
 0x101   :  { %412 = vperm.xlu0 %2784, %v201_v53   ;;  %2796 = vrcp.f32 %v389_v60 }
 0x105   :  { %423 = vperm.xlu0 %2784, %v208_v54  }
 0x10a   :  { %v2795_v61 = vpop.eup %2794 }
 0x10b   :  { %v2797_v0 = vpop.eup %2796  ;;  %v369_v5 = vmul.f32 0.0, %v2795_v61 }
 0x10c   :  { %v393_v8 = vmul.f32 0.0, %v2797_v0 }
 0x167   :  { %v372_v62 = vpop.permute.xlu0 %371 }
 0x168   :  { %v374_v63 = vmul.f32 %v2795_v61, %v372_v62 }
 0x16a   :  { %376 = vrot.lane.b32.xlu1 %v374_v63, %s2935_s14 }
 0x16f   :  { %v396_v1 = vpop.permute.xlu0 %395 }
 0x170   :  { %v398_v2 = vmul.f32 %v2797_v0, %v396_v1  ;;  %v689_v1 = vsub.f32 1.0, %v207_v36 }
 0x172   :  { %400 = vrot.lane.b32.xlu1 %v398_v2, %s2935_s14  ;;  %v202_v2 = vld [vmem:[%s3775_s1 + $0x8] sm:$0xff] }
 0x176   :  { %437 = vperm.xlu1 %2785, %v434_v4  }
 0x180   :  { %v3126_v20 = vpop.permute.xlu0 %412 }
 0x184   :  { %v3137_v26 = vpop.permute.xlu0 %423 }
 0x1dc   :  { %v377_v6 = vpop.permute.xlu1 %376 }
 0x1dd   :  { %v3116_v7 = vadd.f32 %v377_v6, %v369_v5 }
 0x1df   :  { %2798 = vtanh.f32 %v3116_v7 }
 0x1e4   :  { %v401_v9 = vpop.permute.xlu1 %400 }
 0x1e5   :  { %v403_v10 = vadd.f32 %v401_v9, %v393_v8  ;;  %v442_v8 = vmul.f32 %v3126_v20, %v3116_v7 }
 0x1e7   :  { %2800 = vtanh.f32 %v403_v10  ;;  %v452_v32 = vmul.f32 %v3137_v26, %v403_v10 }
 0x1e9   :  { %v2799_v11 = vpop.eup %2798 }
 0x1ea   :  { %382 = vrot.lane.b32.xlu1 %v2799_v11, %s2934_s5 }
 0x1ee   :  { %447 = vperm.xlu1 %2785, %v444_v12  }
 0x1f1   :  { %v2801_v13 = vpop.eup %2800 }
 0x1f2   :  { %406 = vrot.lane.b32.xlu0 %v2801_v13, %s2934_s5 }
 0x1f5   :  { %v438_v15 = vpop.permute.xlu1 %437 }
 0x1f6   :  { %v3128_v21 = vmul.f32 0.0, %v438_v15 }
 0x1f8   :  { %v3184_v9 = vadd.f32 %v442_v8, %v3128_v21 }
 0x25c   :  { %v383_v17 = vpop.permute.xlu1 %382 }
 0x25d   :  { %v385_v19 = vmul.f32 %v2795_v61, %v383_v17 }
 0x25f   :  { %v3131_v23 = vmul.f32 %v3126_v20, %v385_v19  ;;  %v678_v19 = vsub.f32 1.0, %v202_v2 }
 0x261   :  { %v3135_v24 = vadd.f32 %v3128_v21, %v3131_v23  ;;  %v37_v21 = vld [vmem:[%s3772_s0 + $0x10] sm:$0xff] }
 0x262   :  { %2334 = vmatmul.mubr.msk.f32.gmra.mrb[4].mxu0 %vm63_vm0, %v37_v21 }
 0x263   :  { %455 = vrot.lane.b32.xlu1 %v3135_v24, %s2935_s14  ;;  %170 = vmatprep.mubr.f32.mxu0 %v2930_v3 }
 0x264   :  { %v407_v27 = vpop.permute.xlu0 %406 }
 0x265   :  { %v409_v29 = vmul.f32 %v2797_v0, %v407_v27  ;;  %v38_v27 = vld [vmem:[%s3772_s0 + $0x18] sm:$0xff] }
 0x266   :  { %2335 = vmatmul.mubr.msk.f32.gmra.mrb[6].mxu0 %vm63_vm0, %v38_v27 }
 0x267   :  { %v3142_v31 = vmul.f32 %v3137_v26, %v409_v29  ;;  %176 = vmatprep.mubr.f32.mxu0 %v2930_v3  ;;  %v39_v29 = vld [vmem:[%s3772_s0 + $0x20] sm:$0xff] }
 0x26a   :  { %2336 = vmatmul.mubr.msk.f32.gmra.mrb[8].mxu0 %vm63_vm0, %v39_v29 }
 0x26b   :  { %182 = vmatprep.mubr.f32.mxu0 %v2930_v3 }
 0x26d   :  { %v448_v30 = vpop.permute.xlu1 %447 }
 0x26e   :  { %v450_v33 = vmul.f32 0.0, %v448_v30  ;;  %v40_v30 = vld [vmem:[%s3772_s0 + $0x28] sm:$0xff] }
 0x26f   :  { %2337 = vmatmul.mubr.msk.f32.gmra.mrb[10].mxu0 %vm63_vm0, %v40_v30  ;;  %v206_v30 = vld [vmem:[%s3775_s1 + $0x28] sm:$0xff] }
 0x270   :  { %v3146_v35 = vadd.f32 %v450_v33, %v3142_v31  ;;  %v3148_v40 = vadd.f32 %v452_v32, %v450_v33  ;;  %2515 = vmatprep.mubr.msk.f32.mxu0 %vm2932_vm1, %v2930_v3 }
 0x272   :  { %531 = vrot.lane.b32.xlu0 %v3146_v35, %s2935_s14 }
 0x2d5   :  { %v456_v42 = vpop.permute.xlu1 %455 }
 0x2d6   :  { %2494 = vmatmul.mubr.msk.f32.vlgmr.msra.gmra.mrb[8].mxu1 %vm63_vm0, %v456_v42 }
 0x2d7   :  { %2686 = vmatpush3.bf16.msra.mxu1 %v3062_v25  ;;  %2504 = vmatprep.mubr.msk.f32.mxu1 %vm2932_vm1, %v2930_v3 }
 0x2d8   :  { %2687 = vmatprep.subr.bf16.mxu1 %v2931_v18 }
 0x2db   :  { %2689 = vmatpush3.bf16.msra.mxu1 %v3075_v28 }
 0x2dc   :  { %2696 = vmatprep.subr.bf16.mxu1 %v2931_v18 }
 0x2e4   :  { %v532_v43 = vpop.permute.xlu0 %531 }
 0x2e5   :  { %2505 = vmatmul.mubr.msk.f32.vlgmr.msra.gmra.mrb[10].mxu1 %vm63_vm0, %v532_v43 }
 0x2e6   :  { %2698 = vmatpush3.bf16.msra.mxu1 %v3062_v25  ;;  %2526 = vmatprep.mubr.msk.f32.mxu1 %vm2932_vm1, %v2930_v3 }
 0x2e7   :  { %2699 = vmatprep.subr.bf16.mxu1 %v2931_v18 }
 0x2ea   :  { %2701 = vmatpush3.bf16.msra.mxu1 %v3075_v28 }
 0x2eb   :  { %2708 = vmatprep.subr.bf16.mxu1 %v2931_v18 }
 0x3a9   :  { %v525_v47 = vpop.f32.mrb[8].mxu1 }
 0x3aa   :  { %v529_v48 = vadd.f32 %v525_v47, %v161_v45  ;;  %v2495_v49 = vpop.f32.mrb[9].mxu1 }
 0x3ac   :  { %2802 = vtanh.f32 %v529_v48  ;;  %v2344_v56 = vmul.f32 -1.442695, %v529_v48 }
 0x3b6   :  { %v2803_v50 = vpop.eup %2802 }
 0x3b7   :  { %615 = vrot.lane.b32.xlu0 %v2803_v50, %s2934_s5 }
 0x3b8   :  { %v601_v52 = vpop.f32.mrb[10].mxu1 }
 0x3b9   :  { %v605_v53 = vadd.f32 %v601_v52, %v193_v51  ;;  %v2506_v54 = vpop.f32.mrb[11].mxu1 }
 0x3ba   :  { %v166_v54 = vpop.f32.mrb[4].mxu0 }
 0x3bb   :  { %2804 = vtanh.f32 %v605_v53  ;;  %v2345_v58 = vmul.f32 -1.442695, %v605_v53 }
 0x3bc   :  { %2806 = vpow2.f32 %v2344_v56 }
 0x3bd   :  { %2808 = vpow2.f32 %v2345_v58 }
 0x3c5   :  { %v2805_v55 = vpop.eup %2804 }
 0x3c6   :  { %639 = vrot.lane.b32.xlu1 %v2805_v55, %s2934_s5  ;;  %v2807_v57 = vpop.eup %2806  ;;  %v3245_v55 = vpop.f32.mrb[5].mxu0 }
 0x3c7   :  { %v609_v59 = vadd.f32 1.0, %v2807_v57  ;;  %v2809_v60 = vpop.eup %2808  ;;  %v3247_v56 = vpop.f32.mrb[6].mxu0 }
 0x3c8   :  { %v633_v0 = vadd.f32 1.0, %v2809_v60  ;;  %v3249_v57 = vpop.f32.mrb[7].mxu0 }
 0x3c9   :  { %2810 = vrcp.f32 %v609_v59  ;;  %v3251_v58 = vpop.f32.mrb[8].mxu0 }
 0x3ca   :  { %2812 = vrcp.f32 %v633_v0  ;;  %v3253_v59 = vpop.f32.mrb[9].mxu0 }
 0x3cb   :  { %v3255_v60 = vpop.f32.mrb[10].mxu0 }
 0x3d3   :  { %v2811_v61 = vpop.eup %2810 }
 0x3d4   :  { %v2813_v4 = vpop.eup %2812  ;;  %v613_v10 = vmul.f32 %v2811_v61, %v3184_v9 }
 0x3d5   :  { %v637_v14 = vmul.f32 %v2813_v4, %v3148_v40 }
 0x429   :  { %v616_v62 = vpop.permute.xlu0 %615 }
 0x42a   :  { %v618_v63 = vmul.f32 %v2811_v61, %v616_v62 }
 0x42c   :  { %620 = vrot.lane.b32.xlu0 %v618_v63, %s2935_s14 }
 0x430   :  { %692 = vperm.xlu0 %2784, %v689_v1  }
 0x434   :  { %656 = vperm.xlu0 %2784, %v202_v2  }
 0x438   :  { %v640_v5 = vpop.permute.xlu1 %639 }
 0x439   :  { %v642_v6 = vmul.f32 %v2813_v4, %v640_v5 }
 0x43b   :  { %644 = vrot.lane.b32.xlu1 %v642_v6, %s2935_s14 }
 0x43f   :  { %668 = vperm.xlu1 %2785, %v207_v36  }
 0x49e   :  { %v621_v11 = vpop.permute.xlu0 %620 }
 0x49f   :  { %v3187_v12 = vadd.f32 %v621_v11, %v613_v10 }
 0x4a1   :  { %2814 = vtanh.f32 %v3187_v12 }
 0x4ab   :  { %v2815_v13 = vpop.eup %2814 }
 0x4ac   :  { %626 = vrot.lane.b32.xlu0 %v2815_v13, %s2934_s5 }
 0x4ad   :  { %v645_v15 = vpop.permute.xlu1 %644 }
 0x4ae   :  { %v3192_v17 = vadd.f32 %v645_v15, %v637_v14 }
 0x4af   :  { %v3219_v33 = vpop.permute.xlu0 %692 }
 0x4b0   :  { %2816 = vtanh.f32 %v3192_v17  ;;  %v695_v43 = vmul.f32 %v3219_v33, %v3146_v35 }
 0x4b3   :  { %v3229_v48 = vpop.permute.xlu0 %656 }
 0x4ba   :  { %v2817_v7 = vpop.eup %2816 }
 0x4bb   :  { %650 = vrot.lane.b32.xlu1 %v2817_v7, %s2934_s5 }
 0x4be   :  { %v3217_v32 = vpop.permute.xlu1 %668 }
 0x4bf   :  { %681 = vperm.xlu1 %2785, %v678_v19  }
 0x51e   :  { %v627_v49 = vpop.permute.xlu0 %626 }
 0x51f   :  { %v629_v50 = vmul.f32 %v2811_v61, %v627_v49  ;;  %v935_v49 = vsub.f32 1.0, %v206_v30 }
 0x521   :  { %v3236_v52 = vmul.f32 %v3229_v48, %v629_v50  ;;  %v203_v50 = vld [vmem:[%s3775_s1 + $0x10] sm:$0xff] }
 0x52d   :  { %v651_v41 = vpop.permute.xlu1 %650 }
 0x52e   :  { %v653_v42 = vmul.f32 %v2813_v4, %v651_v41  ;;  %v167_v4 = vadd.f32 %v166_v54, %v3098_v38  ;;  %v698_v54 = vmul.f32 %v3219_v33, %v3148_v40 }
 0x530   :  { %v3224_v45 = vmul.f32 %v3217_v32, %v653_v42 }
 0x532   :  { %v3227_v47 = vadd.f32 %v695_v43, %v3224_v45 }
 0x534   :  { %777 = vrot.lane.b32.xlu1 %v3227_v47, %s2935_s14 }
 0x53e   :  { %v3233_v51 = vpop.permute.xlu1 %681 }
 0x53f   :  { %v684_v35 = vmul.f32 %v3233_v51, %v3135_v24  ;;  %v186_v24 = vpop.f32.mrb[11].mxu0 }
 0x540   :  { %v187_v36 = vadd.f32 %v186_v24, %v3103_v46 }
 0x541   :  { %v3241_v53 = vadd.f32 %v684_v35, %v3236_v52  ;;  %v697_v35 = vmul.f32 %v3217_v32, %v3192_v17 }
 0x543   :  { %701 = vrot.lane.b32.xlu0 %v3241_v53, %s2935_s14  ;;  %v3287_v24 = vadd.f32 %v698_v54, %v697_v35  ;;  %v173_v35 = vadd.f32 %v3247_v56, %v3098_v38  ;;  %v205_v56 = vld [vmem:[%s3775_s1 + $0x20] sm:$0xff] }
 0x5a6   :  { %v778_v61 = vpop.permute.xlu1 %777 }
 0x5a7   :  { %2527 = vmatmul.mubr.msk.f32.vlgmr.msra.gmra.mrb[12].mxu1 %vm63_vm0, %v778_v61 }
 0x5a8   :  { %2710 = vmatpush3.bf16.msra.mxu1 %v3062_v25  ;;  %2548 = vmatprep.mubr.msk.f32.mxu1 %vm2932_vm1, %v2930_v3 }
 0x5a9   :  { %2711 = vmatprep.subr.bf16.mxu1 %v2931_v18 }
 0x5ac   :  { %2713 = vmatpush3.bf16.msra.mxu1 %v3075_v28 }
 0x5ad   :  { %2720 = vmatprep.subr.bf16.mxu1 %v2931_v18 }
 0x5b5   :  { %v702_v62 = vpop.permute.xlu0 %701 }
 0x5b6   :  { %2516 = vmatmul.mubr.msk.f32.vlgmr.msra.gmra.mrb[12].mxu0 %vm63_vm0, %v702_v62 }
 0x5b7   :  { %2704 = vmatpush3.bf16.msra.mxu0 %v3026_v16  ;;  %2537 = vmatprep.mubr.msk.f32.mxu0 %vm2932_vm1, %v2930_v3 }
 0x5b8   :  { %2705 = vmatprep.subr.bf16.mxu0 %v2931_v18 }
 0x5bb   :  { %2707 = vmatpush3.bf16.msra.mxu0 %v3046_v22 }
 0x5bc   :  { %2714 = vmatprep.subr.bf16.mxu0 %v2931_v18 }
 0x67a   :  { %v847_v63 = vpop.f32.mrb[12].mxu1 }
 0x67b   :  { %v851_v0 = vadd.f32 %v847_v63, %v187_v36  ;;  %v2528_v1 = vpop.f32.mrb[13].mxu1  ;;  %v687_v63 = vmul.f32 %v3233_v51, %v3184_v9 }
 0x67d   :  { %2818 = vtanh.f32 %v851_v0  ;;  %v2349_v11 = vmul.f32 -1.442695, %v851_v0  ;;  %v686_v0 = vmul.f32 %v3229_v48, %v3187_v12 }
 0x67f   :  { %v3297_v17 = vadd.f32 %v687_v63, %v686_v0 }
 0x687   :  { %v2819_v2 = vpop.eup %2818 }
 0x688   :  { %885 = vrot.lane.b32.xlu1 %v2819_v2, %s2934_s5  ;;  %v924_v2 = vsub.f32 1.0, %v203_v50 }
 0x689   :  { %v771_v5 = vpop.f32.mrb[12].mxu0 }
 0x68a   :  { %v775_v6 = vadd.f32 %v771_v5, %v167_v4  ;;  %v2517_v8 = vpop.f32.mrb[13].mxu0 }
 0x68c   :  { %2820 = vtanh.f32 %v775_v6  ;;  %v2348_v14 = vmul.f32 -1.442695, %v775_v6 }
 0x68d   :  { %2822 = vpow2.f32 %v2349_v11 }
 0x68e   :  { %2824 = vpow2.f32 %v2348_v14 }
 0x696   :  { %v2821_v10 = vpop.eup %2820 }
 0x697   :  { %861 = vrot.lane.b32.xlu0 %v2821_v10, %s2934_s5  ;;  %v2823_v13 = vpop.eup %2822 }
 0x698   :  { %v879_v15 = vadd.f32 1.0, %v2823_v13  ;;  %v2825_v7 = vpop.eup %2824 }
 0x699   :  { %v855_v29 = vadd.f32 1.0, %v2825_v7 }
 0x69a   :  { %2826 = vrcp.f32 %v879_v15 }
 0x69b   :  { %2828 = vrcp.f32 %v855_v29 }
 0x6a4   :  { %v2827_v19 = vpop.eup %2826 }
 0x6a5   :  { %v2829_v41 = vpop.eup %2828  ;;  %v883_v61 = vmul.f32 %v2827_v19, %v3287_v24 }
 0x6a6   :  { %v859_v40 = vmul.f32 %v2829_v41, %v3297_v17 }
 0x6fa   :  { %v886_v21 = vpop.permute.xlu1 %885 }
 0x6fb   :  { %v888_v27 = vmul.f32 %v2827_v19, %v886_v21 }
 0x6fd   :  { %890 = vrot.lane.b32.xlu1 %v888_v27, %s2935_s14 }
 0x701   :  { %914 = vperm.xlu1 %2785, %v206_v30  }
 0x709   :  { %v862_v42 = vpop.permute.xlu0 %861 }
 0x70a   :  { %v864_v43 = vmul.f32 %v2829_v41, %v862_v42 }
 0x70c   :  { %866 = vrot.lane.b32.xlu0 %v864_v43, %s2935_s14 }
 0x710   :  { %938 = vperm.xlu0 %2784, %v935_v49  }
 0x714   :  { %902 = vperm.xlu0 %2784, %v203_v50  }
 0x76f   :  { %v891_v62 = vpop.permute.xlu1 %890 }
 0x770   :  { %v3290_v36 = vadd.f32 %v891_v62, %v883_v61 }
 0x772   :  { %2830 = vtanh.f32 %v3290_v36 }
 0x77c   :  { %v2831_v1 = vpop.eup %2830 }
 0x77d   :  { %896 = vrot.lane.b32.xlu1 %v2831_v1, %s2934_s5 }
 0x77e   :  { %v867_v4 = vpop.permute.xlu0 %866 }
 0x77f   :  { %v3301_v5 = vadd.f32 %v867_v4, %v859_v40 }
 0x780   :  { %v3305_v9 = vpop.permute.xlu1 %914 }
 0x781   :  { %927 = vperm.xlu1 %2785, %v924_v2   ;;  %2832 = vtanh.f32 %v3301_v5 }
 0x78b   :  { %v2833_v6 = vpop.eup %2832 }
 0x78c   :  { %872 = vrot.lane.b32.xlu0 %v2833_v6, %s2934_s5 }
 0x78f   :  { %v3307_v12 = vpop.permute.xlu0 %938 }
 0x790   :  { %v941_v11 = vmul.f32 %v3307_v12, %v3227_v47 }
 0x793   :  { %v3319_v15 = vpop.permute.xlu0 %902 }
 0x7ef   :  { %v897_v8 = vpop.permute.xlu1 %896 }
 0x7f0   :  { %v899_v10 = vmul.f32 %v2827_v19, %v897_v8 }
 0x7f2   :  { %v3312_v13 = vmul.f32 %v3305_v9, %v899_v10 }
 0x7f4   :  { %v3315_v14 = vadd.f32 %v941_v11, %v3312_v13 }
 0x7f6   :  { %1023 = vrot.lane.b32.xlu1 %v3315_v14, %s2935_s14 }
 0x7fe   :  { %v873_v7 = vpop.permute.xlu0 %872 }
 0x7ff   :  { %v875_v21 = vmul.f32 %v2829_v41, %v873_v7  ;;  %v181_v41 = vadd.f32 %v3253_v59, %v3103_v46 }
 0x800   :  { %v3321_v27 = vpop.permute.xlu1 %927 }
 0x801   :  { %v930_v19 = vmul.f32 %v3321_v27, %v3241_v53  ;;  %v3326_v47 = vmul.f32 %v3319_v15, %v875_v21 }
 0x803   :  { %v3329_v29 = vadd.f32 %v930_v19, %v3326_v47  ;;  %v1181_v19 = vsub.f32 1.0, %v205_v56 }
 0x805   :  { %947 = vrot.lane.b32.xlu0 %v3329_v29, %s2935_s14 }
 0x868   :  { %v1024_v30 = vpop.permute.xlu1 %1023 }
 0x869   :  { %2549 = vmatmul.mubr.msk.f32.vlgmr.msra.gmra.mrb[14].mxu1 %vm63_vm0, %v1024_v30  ;;  %v204_v30 = vld [vmem:[%s3775_s1 + $0x18] sm:$0xff] }
 0x86a   :  { %2722 = vmatpush3.bf16.msra.mxu1 %v3062_v25  ;;  %2570 = vmatprep.mubr.msk.f32.mxu1 %vm2932_vm1, %v2930_v3 }
 0x86b   :  { %2723 = vmatprep.subr.bf16.mxu1 %v2931_v18 }
 0x86e   :  { %2725 = vmatpush3.bf16.msra.mxu1 %v3075_v28 }
 0x86f   :  { %2732 = vmatprep.subr.bf16.mxu1 %v2931_v18 }
 0x877   :  { %v948_v53 = vpop.permute.xlu0 %947 }
 0x878   :  { %2538 = vmatmul.mubr.msk.f32.vlgmr.msra.gmra.mrb[14].mxu0 %vm63_vm0, %v948_v53  ;;  %v944_v53 = vmul.f32 %v3307_v12, %v3287_v24 }
 0x879   :  { %2716 = vmatpush3.bf16.msra.mxu0 %v3026_v16  ;;  %2559 = vmatprep.mubr.msk.f32.mxu0 %vm2932_vm1, %v2930_v3 }
 0x87a   :  { %2717 = vmatprep.subr.bf16.mxu0 %v2931_v18 }
 0x87d   :  { %2719 = vmatpush3.bf16.msra.mxu0 %v3046_v22 }
 0x87e   :  { %2726 = vmatprep.subr.bf16.mxu0 %v2931_v18 }
 0x93c   :  { %v1093_v42 = vpop.f32.mrb[14].mxu1 }
 0x93d   :  { %v1097_v43 = vadd.f32 %v1093_v42, %v181_v41  ;;  %v2550_v49 = vpop.f32.mrb[15].mxu1  ;;  %v943_v41 = vmul.f32 %v3305_v9, %v3290_v36 }
 0x93f   :  { %2834 = vtanh.f32 %v1097_v43  ;;  %v2353_v0 = vmul.f32 -1.442695, %v1097_v43  ;;  %v3365_v42 = vadd.f32 %v944_v53, %v943_v41 }
 0x949   :  { %v2835_v50 = vpop.eup %2834 }
 0x94a   :  { %1131 = vrot.lane.b32.xlu1 %v2835_v50, %s2934_s5 }
 0x94b   :  { %v1017_v54 = vpop.f32.mrb[14].mxu0 }
 0x94c   :  { %v1021_v61 = vadd.f32 %v1017_v54, %v173_v35  ;;  %v2539_v62 = vpop.f32.mrb[15].mxu0  ;;  %v933_v35 = vmul.f32 %v3321_v27, %v3297_v17  ;;  %v932_v54 = vmul.f32 %v3319_v15, %v3301_v5 }
 0x94d   :  { %v1170_v62 = vsub.f32 1.0, %v204_v30 }
 0x94e   :  { %2836 = vtanh.f32 %v1021_v61  ;;  %v2352_v1 = vmul.f32 -1.442695, %v1021_v61  ;;  %v3375_v24 = vadd.f32 %v933_v35, %v932_v54  ;;  %v179_v35 = vadd.f32 %v3251_v58, %v3098_v38 }
 0x94f   :  { %2838 = vpow2.f32 %v2353_v0 }
 0x950   :  { %2840 = vpow2.f32 %v2352_v1 }
 0x958   :  { %v2837_v63 = vpop.eup %2836 }
 0x959   :  { %1107 = vrot.lane.b32.xlu0 %v2837_v63, %s2934_s5  ;;  %v2839_v59 = vpop.eup %2838 }
 0x95a   :  { %v1125_v2 = vadd.f32 1.0, %v2839_v59  ;;  %v2841_v40 = vpop.eup %2840 }
 0x95b   :  { %v1101_v10 = vadd.f32 1.0, %v2841_v40 }
 0x95c   :  { %2842 = vrcp.f32 %v1125_v2 }
 0x95d   :  { %2844 = vrcp.f32 %v1101_v10 }
 0x966   :  { %v2843_v4 = vpop.eup %2842 }
 0x967   :  { %v2845_v11 = vpop.eup %2844  ;;  %v1129_v43 = vmul.f32 %v2843_v4, %v3365_v42 }
 0x968   :  { %v1105_v36 = vmul.f32 %v2845_v11, %v3375_v24 }
 0x9bc   :  { %v1132_v6 = vpop.permute.xlu1 %1131 }
 0x9bd   :  { %v1134_v8 = vmul.f32 %v2843_v4, %v1132_v6 }
 0x9bf   :  { %1136 = vrot.lane.b32.xlu1 %v1134_v8, %s2935_s14 }
 0x9c3   :  { %1160 = vperm.xlu1 %2785, %v205_v56  }
 0x9cb   :  { %v1108_v7 = vpop.permute.xlu0 %1107 }
 0x9cc   :  { %v1110_v21 = vmul.f32 %v2845_v11, %v1108_v7 }
 0x9ce   :  { %1112 = vrot.lane.b32.xlu0 %v1110_v21, %s2935_s14 }
 0x9d2   :  { %1184 = vperm.xlu0 %2784, %v1181_v19  }
 0x9d6   :  { %1148 = vperm.xlu0 %2784, %v204_v30  }
 0xa31   :  { %v1137_v49 = vpop.permute.xlu1 %1136 }
 0xa32   :  { %v3368_v50 = vadd.f32 %v1137_v49, %v1129_v43 }
 0xa34   :  { %2846 = vtanh.f32 %v3368_v50 }
 0xa3e   :  { %v2847_v61 = vpop.eup %2846 }
 0xa3f   :  { %1142 = vrot.lane.b32.xlu1 %v2847_v61, %s2934_s5 }
 0xa40   :  { %v1113_v63 = vpop.permute.xlu0 %1112 }
 0xa41   :  { %v3379_v0 = vadd.f32 %v1113_v63, %v1105_v36 }
 0xa42   :  { %v3383_v17 = vpop.permute.xlu1 %1160 }
 0xa43   :  { %1173 = vperm.xlu1 %2785, %v1170_v62   ;;  %2848 = vtanh.f32 %v3379_v0 }
 0xa4d   :  { %v2849_v59 = vpop.eup %2848 }
 0xa4e   :  { %1118 = vrot.lane.b32.xlu0 %v2849_v59, %s2934_s5 }
 0xa51   :  { %v3385_v5 = vpop.permute.xlu0 %1184 }
 0xa52   :  { %v1187_v40 = vmul.f32 %v3385_v5, %v3315_v14 }
 0xa55   :  { %v3397_v10 = vpop.permute.xlu0 %1148 }
 0xab1   :  { %v1143_v1 = vpop.permute.xlu1 %1142 }
 0xab2   :  { %v1145_v2 = vmul.f32 %v2843_v4, %v1143_v1 }
 0xab4   :  { %v3390_v6 = vmul.f32 %v3383_v17, %v1145_v2 }
 0xab6   :  { %v3393_v8 = vadd.f32 %v1187_v40, %v3390_v6 }
 0xab8   :  { %1269 = vrot.lane.b32.xlu1 %v3393_v8, %s2935_s14 }
 0xac0   :  { %v1119_v56 = vpop.permute.xlu0 %1118 }
 0xac1   :  { %v1121_v7 = vmul.f32 %v2845_v11, %v1119_v56  ;;  %v175_v11 = vadd.f32 %v3249_v57, %v3103_v46 }
 0xac2   :  { %v3399_v21 = vpop.permute.xlu1 %1173 }
 0xac3   :  { %v1176_v4 = vmul.f32 %v3399_v21, %v3329_v29  ;;  %v3404_v14 = vmul.f32 %v3397_v10, %v1121_v7 }
 0xac5   :  { %v3407_v19 = vadd.f32 %v1176_v4, %v3404_v14 }
 0xac7   :  { %1193 = vrot.lane.b32.xlu0 %v3407_v19, %s2935_s14 }
 0xb2a   :  { %v1270_v30 = vpop.permute.xlu1 %1269 }
 0xb2b   :  { %2571 = vmatmul.mubr.msk.f32.vlgmr.msra.gmra.mrb[16].mxu1 %vm63_vm0, %v1270_v30 }
 0xb2c   :  { %2734 = vmatpush3.bf16.msra.mxu1 %v3062_v25  ;;  %2592 = vmatprep.mubr.msk.f32.mxu1 %vm2932_vm1, %v2930_v3 }
 0xb2d   :  { %2735 = vmatprep.subr.bf16.mxu1 %v2931_v18 }
 0xb30   :  { %2737 = vmatpush3.bf16.msra.mxu1 %v3075_v28 }
 0xb31   :  { %2744 = vmatprep.subr.bf16.mxu1 %v2931_v18 }
 0xb39   :  { %v1194_v29 = vpop.permute.xlu0 %1193 }
 0xb3a   :  { %2560 = vmatmul.mubr.msk.f32.vlgmr.msra.gmra.mrb[16].mxu0 %vm63_vm0, %v1194_v29 }
 0xb3b   :  { %2728 = vmatpush3.bf16.msra.mxu0 %v3026_v16  ;;  %2581 = vmatprep.mubr.msk.f32.mxu0 %vm2932_vm1, %v2930_v3 }
 0xb3c   :  { %2729 = vmatprep.subr.bf16.mxu0 %v2931_v18 }
 0xb3f   :  { %2731 = vmatpush3.bf16.msra.mxu0 %v3046_v22 }
 0xb40   :  { %2738 = vmatprep.subr.bf16.mxu0 %v2931_v18 }
 0xbfe   :  { %v1339_v53 = vpop.f32.mrb[16].mxu1 }
 0xbff   :  { %v1343_v41 = vadd.f32 %v1339_v53, %v175_v11  ;;  %v2572_v43 = vpop.f32.mrb[17].mxu1  ;;  %v1190_v11 = vmul.f32 %v3385_v5, %v3365_v42  ;;  %v1189_v53 = vmul.f32 %v3383_v17, %v3368_v50 }
 0xc01   :  { %2850 = vtanh.f32 %v1343_v41  ;;  %v2357_v63 = vmul.f32 -1.442695, %v1343_v41  ;;  %v3437_v41 = vadd.f32 %v1190_v11, %v1189_v53 }
 0xc0b   :  { %v2851_v49 = vpop.eup %2850 }
 0xc0c   :  { %1377 = vrot.lane.b32.xlu1 %v2851_v49, %s2934_s5 }
 0xc0d   :  { %v1263_v54 = vpop.f32.mrb[16].mxu0 }
 0xc0e   :  { %v1267_v61 = vadd.f32 %v1263_v54, %v179_v35  ;;  %v2561_v62 = vpop.f32.mrb[17].mxu0  ;;  %v1179_v54 = vmul.f32 %v3399_v21, %v3375_v24 }
 0xc10   :  { %2852 = vtanh.f32 %v1267_v61  ;;  %v2356_v59 = vmul.f32 -1.442695, %v1267_v61  ;;  %v1178_v61 = vmul.f32 %v3397_v10, %v3379_v0  ;;  %v1409_v0 = vmul.f32 %v3393_v8, %v3399_v21 }
 0xc11   :  { %2854 = vpow2.f32 %v2357_v63 }
 0xc12   :  { %2856 = vpow2.f32 %v2356_v59  ;;  %v3447_v42 = vadd.f32 %v1179_v54, %v1178_v61 }
 0xc1a   :  { %v2853_v36 = vpop.eup %2852 }
 0xc1b   :  { %1353 = vrot.lane.b32.xlu0 %v2853_v36, %s2934_s5  ;;  %v2855_v57 = vpop.eup %2854 }
 0xc1c   :  { %v1371_v1 = vadd.f32 1.0, %v2855_v57  ;;  %v2857_v2 = vpop.eup %2856 }
 0xc1d   :  { %v1347_v4 = vadd.f32 1.0, %v2857_v2 }
 0xc1e   :  { %2858 = vrcp.f32 %v1371_v1 }
 0xc1f   :  { %2860 = vrcp.f32 %v1347_v4 }
 0xc28   :  { %v2859_v40 = vpop.eup %2858 }
 0xc29   :  { %v2861_v58 = vpop.eup %2860  ;;  %v1375_v43 = vmul.f32 %v2859_v40, %v3437_v41 }
 0xc2a   :  { %v1351_v50 = vmul.f32 %v2861_v58, %v3447_v42 }
 0xc7e   :  { %v1378_v56 = vpop.permute.xlu1 %1377 }
 0xc7f   :  { %v1380_v7 = vmul.f32 %v2859_v40, %v1378_v56 }
 0xc81   :  { %1382 = vrot.lane.b32.xlu1 %v1380_v7, %s2935_s14 }
 0xc8d   :  { %v1354_v30 = vpop.permute.xlu0 %1353 }
 0xc8e   :  { %v1356_v29 = vmul.f32 %v2861_v58, %v1354_v30 }
 0xc90   :  { %1358 = vrot.lane.b32.xlu0 %v1356_v29, %s2935_s14 }
 0xcf3   :  { %v1383_v49 = vpop.permute.xlu1 %1382 }
 0xcf4   :  { %v3440_v35 = vadd.f32 %v1383_v49, %v1375_v43  ;;  %v185_v49 = vadd.f32 %v3255_v60, %v3098_v38 }
 0xcf6   :  { %2862 = vtanh.f32 %v3440_v35 }
 0xd00   :  { %v2863_v62 = vpop.eup %2862 }
 0xd01   :  { %1388 = vrot.lane.b32.xlu1 %v2863_v62, %s2934_s5 }
 0xd02   :  { %v1359_v36 = vpop.permute.xlu0 %1358 }
 0xd03   :  { %v3451_v63 = vadd.f32 %v1359_v36, %v1351_v50 }
 0xd05   :  { %2864 = vtanh.f32 %v3451_v63 }
 0xd0f   :  { %v2865_v57 = vpop.eup %2864 }
 0xd10   :  { %1364 = vrot.lane.b32.xlu0 %v2865_v57, %s2934_s5 }
 0xd73   :  { %v1389_v59 = vpop.permute.xlu1 %1388 }
 0xd74   :  { %v1391_v24 = vmul.f32 %v2859_v40, %v1389_v59  ;;  %v1404_v40 = vmul.f32 %v3385_v5, %v3407_v19 }
 0xd76   :  { %v3458_v1 = vmul.f32 %v1391_v24, %v3397_v10 }
 0xd78   :  { %v3461_v2 = vadd.f32 %v1409_v0, %v3458_v1 }
 0xd7a   :  { %1491 = vrot.lane.b32.xlu1 %v3461_v2, %s2935_s14 }
 0xd82   :  { %v1365_v56 = vpop.permute.xlu0 %1364 }
 0xd83   :  { %v1367_v7 = vmul.f32 %v2861_v58, %v1365_v56  ;;  %v169_v58 = vadd.f32 %v3245_v55, %v3103_v46 }
 0xd85   :  { %v3466_v4 = vmul.f32 %v1367_v7, %v3383_v17 }
 0xd87   :  { %v3471_v30 = vadd.f32 %v1404_v40, %v3466_v4 }
 0xd89   :  { %1415 = vrot.lane.b32.xlu0 %v3471_v30, %s2935_s14 }
 0xdec   :  { %v1492_v8 = vpop.permute.xlu1 %1491 }
 0xded   :  { %2593 = vmatmul.mubr.msk.f32.vlgmr.msra.gmra.mrb[18].mxu1 %vm63_vm0, %v1492_v8 }
 0xdee   :  { %2746 = vmatpush3.bf16.msra.mxu1 %v3062_v25  ;;  %2614 = vmatprep.mubr.msk.f32.mxu1 %vm2932_vm1, %v2930_v3 }
 0xdef   :  { %2747 = vmatprep.subr.bf16.mxu1 %v2931_v18 }
 0xdf2   :  { %2749 = vmatpush3.bf16.msra.mxu1 %v3075_v28 }
 0xdf3   :  { %2756 = vmatprep.subr.bf16.mxu1 %v2931_v18 }
 0xdfb   :  { %v1416_v19 = vpop.permute.xlu0 %1415 }
 0xdfc   :  { %2582 = vmatmul.mubr.msk.f32.vlgmr.msra.gmra.mrb[18].mxu0 %vm63_vm0, %v1416_v19 }
 0xdfd   :  { %2740 = vmatpush3.bf16.msra.mxu0 %v3026_v16  ;;  %2603 = vmatprep.mubr.msk.f32.mxu0 %vm2932_vm1, %v2930_v3 }
 0xdfe   :  { %2741 = vmatprep.subr.bf16.mxu0 %v2931_v18 }
 0xe01   :  { %2743 = vmatpush3.bf16.msra.mxu0 %v3046_v22 }
 0xe02   :  { %2750 = vmatprep.subr.bf16.mxu0 %v2931_v18 }
 0xec0   :  { %v1561_v29 = vpop.f32.mrb[18].mxu1 }
 0xec1   :  { %v1565_v11 = vadd.f32 %v1561_v29, %v169_v58  ;;  %v2594_v53 = vpop.f32.mrb[19].mxu1  ;;  %v1411_v58 = vmul.f32 %v3440_v35, %v3397_v10  ;;  %v1412_v29 = vmul.f32 %v3437_v41, %v3399_v21 }
 0xec3   :  { %2866 = vtanh.f32 %v1565_v11  ;;  %v2361_v36 = vmul.f32 -1.442695, %v1565_v11  ;;  %v3501_v11 = vadd.f32 %v1412_v29, %v1411_v58 }
 0xecd   :  { %v2867_v43 = vpop.eup %2866 }
 0xece   :  { %1599 = vrot.lane.b32.xlu1 %v2867_v43, %s2934_s5 }
 0xecf   :  { %v1485_v54 = vpop.f32.mrb[18].mxu0 }
 0xed0   :  { %v1489_v61 = vadd.f32 %v1485_v54, %v185_v49  ;;  %v2583_v62 = vpop.f32.mrb[19].mxu0  ;;  %v1406_v54 = vmul.f32 %v3451_v63, %v3383_v17 }
 0xed2   :  { %2868 = vtanh.f32 %v1489_v61  ;;  %v2360_v57 = vmul.f32 -1.442695, %v1489_v61  ;;  %v1407_v61 = vmul.f32 %v3385_v5, %v3447_v42  ;;  %v1631_v5 = vmul.f32 %v3461_v2, %v3321_v27 }
 0xed3   :  { %2870 = vpow2.f32 %v2361_v36 }
 0xed4   :  { %2872 = vpow2.f32 %v2360_v57  ;;  %v3511_v35 = vadd.f32 %v1407_v61, %v1406_v54 }
 0xedc   :  { %v2869_v50 = vpop.eup %2868 }
 0xedd   :  { %1575 = vrot.lane.b32.xlu0 %v2869_v50, %s2934_s5  ;;  %v2871_v55 = vpop.eup %2870 }
 0xede   :  { %v1593_v59 = vadd.f32 1.0, %v2871_v55  ;;  %v2873_v24 = vpop.eup %2872 }
 0xedf   :  { %v1569_v40 = vadd.f32 1.0, %v2873_v24 }
 0xee0   :  { %2874 = vrcp.f32 %v1593_v59 }
 0xee1   :  { %2876 = vrcp.f32 %v1569_v40 }
 0xeea   :  { %v2875_v0 = vpop.eup %2874 }
 0xeeb   :  { %v2877_v60 = vpop.eup %2876  ;;  %v1597_v53 = vmul.f32 %v2875_v0, %v3501_v11 }
 0xeec   :  { %v1573_v21 = vmul.f32 %v2877_v60, %v3511_v35 }
 0xf40   :  { %v1600_v56 = vpop.permute.xlu1 %1599 }
 0xf41   :  { %v1602_v7 = vmul.f32 %v2875_v0, %v1600_v56 }
 0xf43   :  { %1604 = vrot.lane.b32.xlu1 %v1602_v7, %s2935_s14 }
 0xf4f   :  { %v1576_v8 = vpop.permute.xlu0 %1575 }
 0xf50   :  { %v1578_v19 = vmul.f32 %v2877_v60, %v1576_v8 }
 0xf52   :  { %1580 = vrot.lane.b32.xlu0 %v1578_v19, %s2935_s14 }
 0xfb5   :  { %v1605_v43 = vpop.permute.xlu1 %1604 }
 0xfb6   :  { %v3504_v49 = vadd.f32 %v1605_v43, %v1597_v53 }
 0xfb8   :  { %2878 = vtanh.f32 %v3504_v49 }
 0xfc2   :  { %v2879_v62 = vpop.eup %2878 }
 0xfc3   :  { %1610 = vrot.lane.b32.xlu1 %v2879_v62, %s2934_s5 }
 0xfc4   :  { %v1581_v41 = vpop.permute.xlu0 %1580 }
 0xfc5   :  { %v3515_v50 = vadd.f32 %v1581_v41, %v1573_v21 }
 0xfc7   :  { %2880 = vtanh.f32 %v3515_v50 }
 0xfd1   :  { %v2881_v36 = vpop.eup %2880 }
 0xfd2   :  { %1586 = vrot.lane.b32.xlu0 %v2881_v36, %s2934_s5 }
0x1035   :  { %v1611_v55 = vpop.permute.xlu1 %1610 }
0x1036   :  { %v1613_v63 = vmul.f32 %v2875_v0, %v1611_v55  ;;  %v1626_v0 = vmul.f32 %v3471_v30, %v3307_v12 }
0x1038   :  { %v3520_v57 = vmul.f32 %v1613_v63, %v3319_v15 }
0x103a   :  { %v3525_v42 = vadd.f32 %v1631_v5, %v3520_v57  ;;  %v1633_v5 = vmul.f32 %v3504_v49, %v3319_v15 }
0x103c   :  { %1713 = vrot.lane.b32.xlu1 %v3525_v42, %s2935_s14 }
0x1044   :  { %v1587_v59 = vpop.permute.xlu0 %1586 }
0x1045   :  { %v1589_v24 = vmul.f32 %v2877_v60, %v1587_v59  ;;  %v1634_v59 = vmul.f32 %v3501_v11, %v3321_v27 }
0x1047   :  { %v3530_v56 = vmul.f32 %v1589_v24, %v3305_v9  ;;  %v3564_v24 = vadd.f32 %v1634_v59, %v1633_v5 }
0x1049   :  { %v3535_v7 = vadd.f32 %v1626_v0, %v3530_v56 }
0x104b   :  { %1637 = vrot.lane.b32.xlu0 %v3535_v7, %s2935_s14 }
0x10ae   :  { %v1714_v2 = vpop.permute.xlu1 %1713 }
0x10af   :  { %2615 = vmatmul.mubr.msk.f32.vlgmr.msra.gmra.mrb[20].mxu1 %vm63_vm0, %v1714_v2 }
0x10b0   :  { %2758 = vmatpush3.bf16.msra.mxu1 %v3062_v25  ;;  %2636 = vmatprep.mubr.msk.f32.mxu1 %vm2932_vm1, %v2930_v3  ;;  %v163_v25 = vadd.f32 %v3166_v44, %v3103_v46 }
0x10b1   :  { %2759 = vmatprep.subr.bf16.mxu1 %v2931_v18 }
0x10b4   :  { %2761 = vmatpush3.bf16.msra.mxu1 %v3075_v28 }
0x10bd   :  { %v1638_v40 = vpop.permute.xlu0 %1637 }
0x10be   :  { %2604 = vmatmul.mubr.msk.f32.vlgmr.msra.gmra.mrb[20].mxu0 %vm63_vm0, %v1638_v40 }
0x10bf   :  { %2752 = vmatpush3.bf16.msra.mxu0 %v3026_v16  ;;  %2625 = vmatprep.mubr.msk.f32.mxu0 %vm2932_vm1, %v2930_v3  ;;  %v191_v16 = vadd.f32 %v3092_v34, %v3098_v38 }
0x10c0   :  { %2753 = vmatprep.subr.bf16.mxu0 %v2931_v18 }
0x10c3   :  { %2755 = vmatpush3.bf16.msra.mxu0 %v3046_v22 }
0x10c4   :  { %2762 = vmatprep.subr.bf16.mxu0 %v2931_v18 }
0x1182   :  { %v1783_v30 = vpop.f32.mrb[20].mxu1 }
0x1183   :  { %v1787_v60 = vadd.f32 %v1783_v30, %v163_v25  ;;  %v2616_v28 = vpop.f32.mrb[21].mxu1  ;;  %v1628_v25 = vmul.f32 %v3515_v50, %v3305_v9  ;;  %v1629_v30 = vmul.f32 %v3511_v35, %v3307_v12  ;;  %v1853_v12 = vmul.f32 %v3525_v42, %v3233_v51 }
0x1185   :  { %2882 = vtanh.f32 %v1787_v60  ;;  %v2365_v53 = vmul.f32 -1.442695, %v1787_v60  ;;  %v3571_v28 = vadd.f32 %v1629_v30, %v1628_v25 }
0x118f   :  { %v2883_v8 = vpop.eup %2882 }
0x1190   :  { %1821 = vrot.lane.b32.xlu1 %v2883_v8, %s2934_s5 }
0x1191   :  { %v1707_v19 = vpop.f32.mrb[20].mxu0 }
0x1192   :  { %v1711_v58 = vadd.f32 %v1707_v19, %v191_v16  ;;  %v2605_v29 = vpop.f32.mrb[21].mxu0 }
0x1194   :  { %2884 = vtanh.f32 %v1711_v58  ;;  %v2364_v43 = vmul.f32 -1.442695, %v1711_v58 }
0x1195   :  { %2886 = vpow2.f32 %v2365_v53  ;;  %v1848_v53 = vmul.f32 %v3535_v7, %v3219_v33 }
0x1196   :  { %2888 = vpow2.f32 %v2364_v43 }
0x119e   :  { %v2885_v22 = vpop.eup %2884 }
0x119f   :  { %1797 = vrot.lane.b32.xlu0 %v2885_v22, %s2934_s5  ;;  %v2887_v44 = vpop.eup %2886 }
0x11a0   :  { %v1815_v54 = vadd.f32 1.0, %v2887_v44  ;;  %v2889_v61 = vpop.eup %2888 }
0x11a1   :  { %v1791_v36 = vadd.f32 1.0, %v2889_v61 }
0x11a2   :  { %2890 = vrcp.f32 %v1815_v54  ;;  %v157_v54 = vadd.f32 %v3096_v37, %v3103_v46 }
0x11a3   :  { %2892 = vrcp.f32 %v1791_v36 }
0x11ac   :  { %v2891_v62 = vpop.eup %2890 }
0x11ad   :  { %v2893_v34 = vpop.eup %2892  ;;  %v1819_v0 = vmul.f32 %v2891_v62, %v3564_v24 }
0x11ae   :  { %v1795_v27 = vmul.f32 %v2893_v34, %v3571_v28 }
0x1202   :  { %v1822_v21 = vpop.permute.xlu1 %1821 }
0x1203   :  { %v1824_v41 = vmul.f32 %v2891_v62, %v1822_v21 }
0x1205   :  { %1826 = vrot.lane.b32.xlu1 %v1824_v41, %s2935_s14  ;;  %v197_v41 = vadd.f32 %v3100_v39, %v3098_v38 }
0x1211   :  { %v1798_v55 = vpop.permute.xlu0 %1797 }
0x1212   :  { %v1800_v63 = vmul.f32 %v2893_v34, %v1798_v55 }
0x1214   :  { %1802 = vrot.lane.b32.xlu0 %v1800_v63, %s2935_s14 }
0x1277   :  { %v1827_v2 = vpop.permute.xlu1 %1826 }
0x1278   :  { %v1829_v40 = vadd.f32 %v1827_v2, %v1819_v0 }
0x127a   :  { %2894 = vtanh.f32 %v1829_v40 }
0x1284   :  { %v2895_v60 = vpop.eup %2894 }
0x1285   :  { %1832 = vrot.lane.b32.xlu1 %v2895_v60, %s2934_s5 }
0x1286   :  { %v1803_v11 = vpop.permute.xlu0 %1802 }
0x1287   :  { %v1805_v49 = vadd.f32 %v1803_v11, %v1795_v27  ;;  %v1855_v27 = vmul.f32 %v1829_v40, %v3229_v48  ;;  %v1856_v11 = vmul.f32 %v3564_v24, %v3233_v51 }
0x1289   :  { %2896 = vtanh.f32 %v1805_v49 }
0x1293   :  { %v2897_v8 = vpop.eup %2896 }
0x1294   :  { %1808 = vrot.lane.b32.xlu0 %v2897_v8, %s2934_s5  ;;  %v1857_v8 = vadd.f32 %v1856_v11, %v1855_v27 }
0x12f7   :  { %v1833_v16 = vpop.permute.xlu1 %1832 }
0x12f8   :  { %v1835_v19 = vmul.f32 %v2891_v62, %v1833_v16 }
0x12fa   :  { %v3577_v50 = vmul.f32 %v1835_v19, %v3229_v48 }
0x12fc   :  { %v1854_v35 = vadd.f32 %v1853_v12, %v3577_v50 }
0x12fe   :  { %1935 = vrot.lane.b32.xlu1 %v1854_v35, %s2935_s14  ;;  %v1850_v35 = vmul.f32 %v1805_v49, %v3217_v32 }
0x1306   :  { %v1809_v58 = vpop.permute.xlu0 %1808 }
0x1307   :  { %v1811_v29 = vmul.f32 %v2893_v34, %v1809_v58  ;;  %v1851_v58 = vmul.f32 %v3571_v28, %v3219_v33 }
0x1309   :  { %v3584_v22 = vmul.f32 %v1811_v29, %v3217_v32 }
0x130b   :  { %v1849_v44 = vadd.f32 %v1848_v53, %v3584_v22  ;;  %v1852_v53 = vadd.f32 %v1851_v58, %v1850_v35 }
0x130d   :  { %1859 = vrot.lane.b32.xlu0 %v1849_v44, %s2935_s14 }
0x1370   :  { %v1936_v43 = vpop.permute.xlu1 %1935 }
0x1371   :  { %2637 = vmatmul.mubr.msk.f32.vlgmr.msra.gmra.mrb[22].mxu1 %vm63_vm0, %v1936_v43 }
0x137f   :  { %v1860_v42 = vpop.permute.xlu0 %1859 }
0x1380   :  { %2626 = vmatmul.mubr.msk.f32.vlgmr.msra.gmra.mrb[22].mxu0 %vm63_vm0, %v1860_v42 }
0x1381   :  { %2655 = vmatprep.mubr.msk.f32.mxu0 %vm2932_vm1, %v2930_v3 }
0x1444   :  { %v2005_v61 = vpop.f32.mrb[22].mxu1 }
0x1445   :  { %v2009_v62 = vadd.f32 %v2005_v61, %v157_v54  ;;  %v2638_v21 = vpop.f32.mrb[23].mxu1 }
0x1447   :  { %2898 = vtanh.f32 %v2009_v62  ;;  %v2369_v3 = vmul.f32 -1.442695, %v2009_v62 }
0x1451   :  { %v2899_v7 = vpop.eup %2898 }
0x1452   :  { %2043 = vrot.lane.b32.xlu1 %v2899_v7, %s2934_s5 }
0x1453   :  { %v1929_v36 = vpop.f32.mrb[22].mxu0 }
0x1454   :  { %v1933_v34 = vadd.f32 %v1929_v36, %v197_v41  ;;  %v2627_v55 = vpop.f32.mrb[23].mxu0 }
0x1456   :  { %2900 = vtanh.f32 %v1933_v34  ;;  %v2368_v46 = vmul.f32 -1.442695, %v1933_v34 }
0x1457   :  { %2902 = vpow2.f32 %v2369_v3 }
0x1458   :  { %2904 = vpow2.f32 %v2368_v46 }
0x1460   :  { %v2901_v63 = vpop.eup %2900 }
0x1461   :  { %2019 = vrot.lane.b32.xlu0 %v2901_v63, %s2934_s5  ;;  %v2903_v37 = vpop.eup %2902 }
0x1462   :  { %v2037_v5 = vadd.f32 1.0, %v2903_v37  ;;  %v2905_v59 = vpop.eup %2904 }
0x1463   :  { %v2013_v30 = vadd.f32 1.0, %v2905_v59 }
0x1464   :  { %2906 = vrcp.f32 %v2037_v5 }
0x1465   :  { %2908 = vrcp.f32 %v2013_v30 }
0x146e   :  { %v2907_v0 = vpop.eup %2906 }
0x146f   :  { %v2909_v38 = vpop.eup %2908  ;;  %v2041_v16 = vmul.f32 %v2907_v0, %v1857_v8 }
0x1470   :  { %v2017_v44 = vmul.f32 %v2909_v38, %v1852_v53 }
0x14c4   :  { %v2044_v2 = vpop.permute.xlu1 %2043 }
0x14c5   :  { %v2046_v25 = vmul.f32 %v2907_v0, %v2044_v2 }
0x14c7   :  { %2048 = vrot.lane.b32.xlu1 %v2046_v25, %s2935_s14 }
0x14d3   :  { %v2020_v39 = vpop.permute.xlu0 %2019 }
0x14d4   :  { %v2022_v60 = vmul.f32 %v2909_v38, %v2020_v39 }
0x14d6   :  { %2024 = vrot.lane.b32.xlu0 %v2022_v60, %s2935_s14 }
0x1539   :  { %v2049_v19 = vpop.permute.xlu1 %2048 }
0x153a   :  { %v2051_v12 = vadd.f32 %v2049_v19, %v2041_v16 }
0x153c   :  { %2910 = vtanh.f32 %v2051_v12 }
0x1546   :  { %v2911_v29 = vpop.eup %2910 }
0x1547   :  { %2054 = vrot.lane.b32.xlu1 %v2911_v29, %s2934_s5 }
0x1548   :  { %v2025_v43 = vpop.permute.xlu0 %2024 }
0x1549   :  { %v2027_v40 = vadd.f32 %v2025_v43, %v2017_v44 }
0x154b   :  { %417 = vrot.lane.b32.xlu1 %v3131_v23, %s2935_s14  ;;  %2912 = vtanh.f32 %v2027_v40 }
0x154f   :  { %1844 = vrot.lane.b32.xlu1 %v3577_v50, %s2934_s5 }
0x1553   :  { %907 = vrot.lane.b32.xlu1 %v3326_v47, %s2935_s14 }
0x1555   :  { %v2913_v51 = vpop.eup %2912 }
0x1556   :  { %2030 = vrot.lane.b32.xlu0 %v2913_v51, %s2934_s5 }
0x1557   :  { %1153 = vrot.lane.b32.xlu1 %v3404_v14, %s2935_s14 }
0x155a   :  { %661 = vrot.lane.b32.xlu0 %v3236_v52, %s2935_s14 }
0x155b   :  { %1165 = vrot.lane.b32.xlu1 %v3390_v6, %s2934_s5 }
0x155e   :  { %1622 = vrot.lane.b32.xlu0 %v3520_v57, %s2934_s5 }
0x155f   :  { %919 = vrot.lane.b32.xlu1 %v3312_v13, %s2934_s5 }
0x1562   :  { %1400 = vrot.lane.b32.xlu0 %v3458_v1, %s2934_s5 }
0x1563   :  { %673 = vrot.lane.b32.xlu1 %v3224_v45, %s2934_s5 }
0x1566   :  { %1394 = vrot.lane.b32.xlu0 %v3466_v4, %s2935_s14 }
0x1567   :  { %428 = vrot.lane.b32.xlu1 %v3142_v31, %s2934_s5 }
0x15b9   :  { %v2055_v23 = vpop.permute.xlu1 %2054 }
0x15ba   :  { %v2057_v33 = vmul.f32 %v2907_v0, %v2055_v23 }
0x15bc   :  { %v2064_v52 = vmul.f32 %v2057_v33, %v3126_v20 }
0x15bd   :  { %v418_v47 = vpop.permute.xlu1 %417 }
0x15be   :  { %420 = vst.msk [vmem:[#allocation2] sm:$0xff] %vm63_vm0, %v418_v47  ;;  %2066 = vrot.lane.b32.xlu0 %v2064_v52, %s2934_s5 }
0x15c1   :  { %v1845_v13 = vpop.permute.xlu1 %1844 }
0x15c2   :  { %1616 = vrot.lane.b32.xlu0 %v3530_v56, %s2935_s14 }
0x15c5   :  { %v908_v45 = vpop.permute.xlu1 %907 }
0x15c6   :  { %911 = vst.msk [vmem:[#allocation2 + $0x10] sm:$0xff] %vm63_vm0, %v908_v45  ;;  %1838 = vrot.lane.b32.xlu0 %v3584_v22, %s2935_s14 }
0x15c8   :  { %v2031_v31 = vpop.permute.xlu0 %2030 }
0x15c9   :  { %v1154_v6 = vpop.permute.xlu1 %1153  ;;  %v2033_v14 = vmul.f32 %v2909_v38, %v2031_v31 }
0x15ca   :  { %1157 = vst.msk [vmem:[#allocation2 + $0x18] sm:$0xff] %vm63_vm0, %v1154_v6 }
0x15cb   :  { %v2058_v1 = vmul.f32 %v2033_v14, %v3137_v26 }
0x15cc   :  { %v662_v4 = vpop.permute.xlu0 %661 }
0x15cd   :  { %v1166_v57 = vpop.permute.xlu1 %1165  ;;  %665 = vst.msk [vmem:[#allocation2 + $0x8] sm:$0xff] %vm63_vm0, %v662_v4  ;;  %2060 = vrot.lane.b32.xlu0 %v2058_v1, %s2935_s14 }
0x15ce   :  { %1169 = vst.msk [vmem:[#allocation2 + $0x20] sm:$0xff] %vm432_vm2, %v1166_v57  ;;  %1847 = vst.msk [vmem:[#allocation2 + $0x8] sm:$0xff] %vm432_vm2, %v1845_v13 }
0x15d0   :  { %v1623_v56 = vpop.permute.xlu0 %1622 }
0x15d1   :  { %v920_v24 = vpop.permute.xlu1 %919  ;;  %1625 = vst.msk [vmem:[#allocation2 + $0x10] sm:$0xff] %vm432_vm2, %v1623_v56 }
0x15d2   :  { %923 = vst.msk [vmem:[#allocation2 + $0x28] sm:$0xff] %vm432_vm2, %v920_v24 }
0x15d4   :  { %v1401_v28 = vpop.permute.xlu0 %1400 }
0x15d5   :  { %v674_v49 = vpop.permute.xlu1 %673  ;;  %1403 = vst.msk [vmem:[#allocation2 + $0x18] sm:$0xff] %vm432_vm2, %v1401_v28  ;;  %v2071_v42 = vld [vmem:[#allocation2 + $0x8] sm:$0xff] }
0x15d6   :  { %677 = vst.msk [vmem:[#allocation2 + $0x30] sm:$0xff] %vm432_vm2, %v674_v49  ;;  %v2082_v54 = vsel %vm2078_vm3, %v2071_v42, 0.0 }
0x15d8   :  { %v1395_v50 = vpop.permute.xlu0 %1394  ;;  %v2072_v61 = vld [vmem:[#allocation2 + $0x10] sm:$0xff] }
0x15d9   :  { %v429_v22 = vpop.permute.xlu1 %428  ;;  %1397 = vst.msk [vmem:[#allocation2 + $0x20] sm:$0xff] %vm63_vm0, %v1395_v50  ;;  %v2085_v62 = vsel %vm2078_vm3, %v2072_v61, 0.0 }
0x15da   :  { %433 = vst.msk [vmem:[#allocation2 + $0x38] sm:$0xff] %vm432_vm2, %v429_v22 }
0x15dc   :  { %v2073_v3 = vld [vmem:[#allocation2 + $0x18] sm:$0xff] }
0x15dd   :  { %v2088_v37 = vsel %vm2078_vm3, %v2073_v3, 0.0 }
0x15e0   :  { %v2074_v21 = vld [vmem:[#allocation2 + $0x20] sm:$0xff] }
0x15e1   :  { %v2091_v7 = vsel %vm2078_vm3, %v2074_v21, 0.0 }
0x15ec   :  { %2083 = vadd.xlane.f32.xlu0 %v2082_v54 }
0x15f0   :  { %2086 = vadd.xlane.f32.xlu0 %v2085_v62 }
0x15f4   :  { %2092 = vadd.xlane.f32.xlu0 %v2091_v7  ;;  %v2238_v7 = vld [vmem:[%s3776_s8] sm:$0xff] }
0x1630   :  { %v2067_v41 = vpop.permute.xlu0 %2066 }
0x1631   :  { %2069 = vst.msk [vmem:[#allocation2] sm:$0xff] %vm432_vm2, %v2067_v41  ;;  %v2239_v41 = vld [vmem:[%s3776_s8 + $0x8] sm:$0xff] }
0x1634   :  { %v1617_v36 = vpop.permute.xlu0 %1616 }
0x1635   :  { %1619 = vst.msk [vmem:[#allocation2 + $0x28] sm:$0xff] %vm63_vm0, %v1617_v36  ;;  %v2763_v36 = vpack.c.bf16 %v2239_v41, %v2238_v7 }
0x1637   :  { %2764 = vmatpush3.bf16.msra.mxu0 %v2763_v36 }
0x1638   :  { %v1839_v34 = vpop.permute.xlu0 %1838  ;;  %v2070_v55 = vld [vmem:[#allocation2] sm:$0xff]  ;;  %2765 = vmatprep.subr.bf16.mxu0 %v2931_v18 }
0x1639   :  { %1841 = vst.msk [vmem:[#allocation2 + $0x30] sm:$0xff] %vm63_vm0, %v1839_v34  ;;  %v2079_v63 = vsel %vm2078_vm3, %v2070_v55, 0.0  ;;  %v2240_v34 = vld [vmem:[%s3776_s8 + $0x10] sm:$0xff] }
0x163a   :  { %2080 = vadd.xlane.f32.xlu1 %v2079_v63 }
0x163c   :  { %v2075_v46 = vld [vmem:[#allocation2 + $0x28] sm:$0xff] }
0x163d   :  { %v2094_v0 = vsel %vm2078_vm3, %v2075_v46, 0.0 }
0x163e   :  { %2089 = vadd.xlane.f32.xlu1 %v2088_v37  ;;  %v2243_v37 = vld [vmem:[%s3776_s8 + $0x28] sm:$0xff] }
0x163f   :  { %v2061_v5 = vpop.permute.xlu0 %2060 }
0x1640   :  { %v2076_v59 = vld [vmem:[#allocation2 + $0x30] sm:$0xff]  ;;  %2063 = vst.msk [vmem:[#allocation2 + $0x38] sm:$0xff] %vm63_vm0, %v2061_v5 }
0x1641   :  { %v2097_v2 = vsel %vm2078_vm3, %v2076_v59, 0.0  ;;  %v2244_v5 = vld [vmem:[%s3776_s8 + $0x30] sm:$0xff] }
0x1642   :  { %2095 = vadd.xlane.f32.xlu1 %v2094_v0  ;;  %2098 = vadd.xlane.f32.xlu0 %v2097_v2 }
0x1647   :  { %v2077_v25 = vld [vmem:[#allocation2 + $0x38] sm:$0xff] }
0x1648   :  { %v2100_v30 = vsel %vm2078_vm3, %v2077_v25, 0.0 }
0x1649   :  { %2101 = vadd.xlane.f32.xlu1 %v2100_v30 }
0x1679   :  { %v2084_v38 = vpop.xlane.xlu0 %2083 }
0x167a   :  { %v2105_v39 = vmul.f32 0.015625, %v2084_v38 }
0x167c   :  { %v3666_v60 = vsub.f32 %v2071_v42, %v2105_v39 }
0x167d   :  { %v2087_v8 = vpop.xlane.xlu0 %2086 }
0x167e   :  { %v2121_v27 = vmul.f32 %v3666_v60, %v3666_v60  ;;  %v2106_v16 = vmul.f32 0.015625, %v2087_v8 }
0x1680   :  { %v2131_v11 = vsel %vm2078_vm3, %v2121_v27, 0.0  ;;  %v3671_v58 = vsub.f32 %v2072_v61, %v2106_v16 }
0x1681   :  { %2132 = vadd.xlane.f32.xlu1 %v2131_v11  ;;  %v2093_v19 = vpop.xlane.xlu0 %2092 }
0x1682   :  { %v2108_v29 = vmul.f32 0.015625, %v2093_v19  ;;  %v2122_v51 = vmul.f32 %v3671_v58, %v3671_v58 }
0x1684   :  { %v3679_v23 = vsub.f32 %v2074_v21, %v2108_v29  ;;  %v2134_v14 = vsel %vm2078_vm3, %v2122_v51, 0.0 }
0x1686   :  { %v2124_v56 = vmul.f32 %v3679_v23, %v3679_v23 }
0x1688   :  { %v2140_v28 = vsel %vm2078_vm3, %v2124_v56, 0.0 }
0x16c7   :  { %v2081_v12 = vpop.xlane.xlu1 %2080 }
0x16c8   :  { %v2104_v35 = vmul.f32 0.015625, %v2081_v12 }
0x16ca   :  { %v3673_v53 = vsub.f32 %v2070_v55, %v2104_v35  ;;  %v2241_v55 = vld [vmem:[%s3776_s8 + $0x18] sm:$0xff] }
0x16cb   :  { %v2090_v44 = vpop.xlane.xlu1 %2089  ;;  %v2766_v63 = vpack.c.bf16 %v2241_v55, %v2240_v34 }
0x16cc   :  { %v2107_v43 = vmul.f32 0.015625, %v2090_v44  ;;  %v2120_v40 = vmul.f32 %v3673_v53, %v3673_v53 }
0x16cd   :  { %2767 = vmatpush3.bf16.msra.mxu0 %v2766_v63 }
0x16ce   :  { %v3681_v33 = vsub.f32 %v2073_v3, %v2107_v43  ;;  %v2128_v52 = vsel %vm2078_vm3, %v2120_v40, 0.0  ;;  %2768 = vmatprep.subr.bf16.mxu0 %v2931_v18  ;;  %v2242_v3 = vld [vmem:[%s3776_s8 + $0x20] sm:$0xff] }
0x16cf   :  { %v2099_v47 = vpop.xlane.xlu0 %2098  ;;  %2129 = vadd.xlane.f32.xlu0 %v2128_v52  ;;  %v2096_v13 = vpop.xlane.xlu1 %2095  ;;  %v2370_v52 = vld [vmem:[%s3777_s6] ss:$0 sm:$0xff] }
0x16d0   :  { %v2110_v45 = vmul.f32 0.015625, %v2099_v47  ;;  %v2109_v31 = vmul.f32 0.015625, %v2096_v13  ;;  %v2123_v6 = vmul.f32 %v3681_v33, %v3681_v33 }
0x16d2   :  { %v3687_v1 = vsub.f32 %v2076_v59, %v2110_v45  ;;  %v3689_v4 = vsub.f32 %v2075_v46, %v2109_v31  ;;  %v2137_v57 = vsel %vm2078_vm3, %v2123_v6, 0.0  ;;  %v2769_v46 = vpack.c.bf16 %v2243_v37, %v2242_v3  ;;  %v2245_v59 = vld [vmem:[%s3776_s8 + $0x38] sm:$0xff] }
0x16d3   :  { %2135 = vadd.xlane.f32.xlu0 %v2134_v14  ;;  %2138 = vadd.xlane.f32.xlu1 %v2137_v57  ;;  %v2772_v0 = vpack.c.bf16 %v2245_v59, %v2244_v5  ;;  %v2371_v57 = vld [vmem:[%s3778_s7] ss:$0 sm:$0xff] }
0x16d4   :  { %v2125_v24 = vmul.f32 %v3689_v4, %v3689_v4  ;;  %v2126_v50 = vmul.f32 %v3687_v1, %v3687_v1  ;;  %2770 = vmatpush3.bf16.msra.mxu0 %v2769_v46 }
0x16d5   :  { %2771 = vmatprep.subr.bf16.mxu0 %v2931_v18 }
0x16d6   :  { %v2143_v49 = vsel %vm2078_vm3, %v2125_v24, 0.0  ;;  %v2102_v22 = vpop.xlane.xlu1 %2101  ;;  %v2146_v61 = vsel %vm2078_vm3, %v2126_v50, 0.0 }
0x16d7   :  { %2141 = vadd.xlane.f32.xlu0 %v2140_v28  ;;  %2144 = vadd.xlane.f32.xlu1 %v2143_v49  ;;  %v2111_v42 = vmul.f32 0.015625, %v2102_v22 }
0x16d8   :  { %2773 = vmatpush3.bf16.msra.mxu0 %v2772_v0 }
0x16d9   :  { %v3700_v54 = vsub.f32 %v2077_v25, %v2111_v42 }
0x16db   :  { %2147 = vadd.xlane.f32.xlu0 %v2146_v61  ;;  %v2127_v62 = vmul.f32 %v3700_v54, %v3700_v54 }
0x16dd   :  { %v2149_v21 = vsel %vm2078_vm3, %v2127_v62, 0.0 }
0x16de   :  { %2150 = vadd.xlane.f32.xlu1 %v2149_v21 }
0x170e   :  { %v2133_v2 = vpop.xlane.xlu1 %2132 }
0x170f   :  { %v2153_v25 = vmul.f32 0.015625, %v2133_v2 }
0x1711   :  { %v2161_v30 = vadd.f32 1e-05, %v2153_v25 }
0x1713   :  { %2914 = vrsqrt.f32 %v2161_v30 }
0x171d   :  { %v2915_v12 = vpop.eup %2914 }
0x171e   :  { %v2177_v51 = vmul.f32 %v2915_v12, %v3666_v60 }
0x1720   :  { %v2192_v6 = vmul.f32 %v2370_v52, %v2177_v51 }
0x1722   :  { %v2207_v49 = vadd.f32 %v2371_v57, %v2192_v6 }
0x1724   :  { %v2215_v41 = vmul.f32 %v2207_v49, %v3229_v48 }
0x175c   :  { %v2130_v38 = vpop.xlane.xlu0 %2129 }
0x175d   :  { %v2152_v39 = vmul.f32 0.015625, %v2130_v38 }
0x175f   :  { %v2160_v27 = vadd.f32 1e-05, %v2152_v39 }
0x1760   :  { %v2136_v11 = vpop.xlane.xlu0 %2135  ;;  %v2139_v8 = vpop.xlane.xlu1 %2138 }
0x1761   :  { %2916 = vrsqrt.f32 %v2160_v27  ;;  %v2154_v16 = vmul.f32 0.015625, %v2136_v11  ;;  %v2155_v19 = vmul.f32 0.015625, %v2139_v8 }
0x1763   :  { %v2162_v35 = vadd.f32 1e-05, %v2154_v16  ;;  %v2163_v29 = vadd.f32 1e-05, %v2155_v19 }
0x1764   :  { %v2142_v44 = vpop.xlane.xlu0 %2141  ;;  %v2145_v43 = vpop.xlane.xlu1 %2144 }
0x1765   :  { %2918 = vrsqrt.f32 %v2162_v35  ;;  %v2156_v18 = vmul.f32 0.015625, %v2142_v44  ;;  %v2157_v40 = vmul.f32 0.015625, %v2145_v43 }
0x1766   :  { %2920 = vrsqrt.f32 %v2163_v29 }
0x1767   :  { %v2164_v47 = vadd.f32 1e-05, %v2156_v18  ;;  %v2165_v13 = vadd.f32 1e-05, %v2157_v40 }
0x1768   :  { %v2148_v45 = vpop.xlane.xlu0 %2147 }
0x1769   :  { %2922 = vrsqrt.f32 %v2164_v47  ;;  %v2158_v31 = vmul.f32 0.015625, %v2148_v45 }
0x176a   :  { %2924 = vrsqrt.f32 %v2165_v13 }
0x176b   :  { %v2917_v14 = vpop.eup %2916  ;;  %v2166_v56 = vadd.f32 1e-05, %v2158_v31  ;;  %v2151_v24 = vpop.xlane.xlu1 %2150 }
0x176c   :  { %v2176_v60 = vmul.f32 %v2917_v14, %v3673_v53  ;;  %v2159_v28 = vmul.f32 0.015625, %v2151_v24 }
0x176d   :  { %2926 = vrsqrt.f32 %v2166_v56 }
0x176e   :  { %v2191_v50 = vmul.f32 %v2370_v52, %v2176_v60  ;;  %v2167_v42 = vadd.f32 1e-05, %v2159_v28 }
0x176f   :  { %v2919_v22 = vpop.eup %2918 }
0x1770   :  { %v2921_v61 = vpop.eup %2920  ;;  %v2206_v62 = vadd.f32 %v2371_v57, %v2191_v50  ;;  %v2178_v21 = vmul.f32 %v2919_v22, %v3671_v58  ;;  %2928 = vrsqrt.f32 %v2167_v42  ;;  %v2223_v58 = vsel %vm2078_vm3, %v2215_v41, 0.0 }
0x1771   :  { %v2179_v7 = vmul.f32 %v2921_v61, %v3681_v33 }
0x1772   :  { %v2214_v36 = vmul.f32 %v2206_v62, %v3126_v20  ;;  %v2193_v34 = vmul.f32 %v2370_v52, %v2178_v21 }
0x1773   :  { %v2923_v53 = vpop.eup %2922  ;;  %v2194_v55 = vmul.f32 %v2370_v52, %v2179_v7 }
0x1774   :  { %v2925_v63 = vpop.eup %2924  ;;  %v2222_v3 = vsel %vm2078_vm3, %v2214_v36, 0.0  ;;  %v2208_v37 = vadd.f32 %v2371_v57, %v2193_v34  ;;  %v2180_v46 = vmul.f32 %v2923_v53, %v3679_v23 }
0x1775   :  { %v2209_v5 = vadd.f32 %v2371_v57, %v2194_v55  ;;  %v2181_v59 = vmul.f32 %v2925_v63, %v3689_v4  ;;  %v2224_v2 = vadd.f32 %v2223_v58, %v2222_v3 }
0x1776   :  { %v2216_v33 = vmul.f32 %v2208_v37, %v3319_v15  ;;  %v2195_v0 = vmul.f32 %v2370_v52, %v2180_v46 }
0x1777   :  { %v2927_v48 = vpop.eup %2926  ;;  %v2217_v20 = vmul.f32 %v2209_v5, %v3397_v10  ;;  %v2196_v25 = vmul.f32 %v2370_v52, %v2181_v59 }
0x1778   :  { %v2225_v30 = vsel %vm2078_vm3, %v2216_v33, 0.0  ;;  %v2210_v38 = vadd.f32 %v2371_v57, %v2195_v0  ;;  %v2182_v39 = vmul.f32 %v2927_v48, %v3687_v1 }
0x1779   :  { %v2226_v27 = vadd.f32 %v2225_v30, %v2224_v2  ;;  %v2211_v23 = vadd.f32 %v2371_v57, %v2196_v25  ;;  %v2227_v11 = vsel %vm2078_vm3, %v2217_v20, 0.0 }
0x177a   :  { %v2218_v4 = vmul.f32 %v2210_v38, %v3383_v17  ;;  %v2197_v8 = vmul.f32 %v2370_v52, %v2182_v39  ;;  %v2929_v16 = vpop.eup %2928 }
0x177b   :  { %v2219_v15 = vmul.f32 %v2211_v23, %v3305_v9  ;;  %v2228_v19 = vadd.f32 %v2227_v11, %v2226_v27  ;;  %v2183_v10 = vmul.f32 %v2929_v16, %v3700_v54  ;;  %v2372_v54 = vld [vmem:[%s3779_s9] ss:$0 sm:$0xff] }
0x177c   :  { %v2212_v12 = vadd.f32 %v2371_v57, %v2197_v8  ;;  %v2229_v35 = vsel %vm2078_vm3, %v2218_v4, 0.0 }
0x177d   :  { %v2230_v29 = vadd.f32 %v2229_v35, %v2228_v19  ;;  %v2198_v44 = vmul.f32 %v2370_v52, %v2183_v10  ;;  %v2231_v43 = vsel %vm2078_vm3, %v2219_v15, 0.0 }
0x177e   :  { %v2220_v1 = vmul.f32 %v2212_v12, %v3217_v32 }
0x177f   :  { %v2232_v18 = vadd.f32 %v2231_v43, %v2230_v29  ;;  %v2213_v40 = vadd.f32 %v2371_v57, %v2198_v44 }
0x1780   :  { %v2233_v17 = vsel %vm2078_vm3, %v2220_v1, 0.0 }
0x1781   :  { %v2234_v51 = vadd.f32 %v2233_v17, %v2232_v18  ;;  %v2221_v47 = vmul.f32 %v2213_v40, %v3137_v26 }
0x1783   :  { %v2235_v9 = vsel %vm2078_vm3, %v2221_v47, 0.0 }
0x1784   :  { %v2236_v13 = vadd.f32 %v2235_v9, %v2234_v51 }
0x1786   :  { %v2237_v45 = vmul.f32 0.125, %v2236_v13 }
0x1788   :  { %2656 = vmatmul.mubr.msk.f32.vlgmr.msra.gmra.mrb[24].mxu0 %vm2078_vm3, %v2237_v45 }
0x185b   :  { %v2322_v32 = vpop.f32.mrb[24].mxu0 }
0x185c   :  { %v2323_v52 = vadd.f32 %v2372_v54, %v2322_v32  ;;  %v2657_v31 = vpop.f32.mrb[25].mxu0 }
0x185e   :  { %2327 = vst.msk [vmem:[%s3780_s10] sm:$0xff] %vm2326_vm4, %v2323_v52 }

</bundles_post_ra>
